<compile_context>
chip_gen: v7x
topology: tpu7x:2x2x1
jax: 0.10.0
libtpu: 0.0.40
codegen_flags: <defaults>
</compile_context>

<pallas_src>
import functools
import math

import jax
import jax.numpy as jnp
from jax import lax
from jax.experimental import pallas as pl
from jax.experimental.pallas import tpu as pltpu

_EPS = 1e-5
_LANE = 128


# ----------------------------- Pallas kernel ------------------------------ #

def _block_kernel(x_ref, dw1_w_ref, dw1_b_ref, f12_w_ref, f12_b_ref,
                  g_w_ref, g_b_ref, dw2_w_ref, dw2_b_ref, o_ref, *, H, NE):
    x = x_ref[...]                                # (RB, L) f32
    RB = x.shape[0]

    # Height of each row within its image column (all lanes of a row share the
    # same height) -> (RB, 1) masks, hoisted out of both depthwise convs.
    h = lax.broadcasted_iota(jnp.int32, (RB, 1), 0) % H
    valid = {d: jnp.logical_and(h + d >= 0, h + d < H)
             for d in (-3, -2, -1, 1, 2, 3)}

    def dwconv7(inp, w_ref, b_ref):
        # Depthwise (7,1) conv along H: sublane rolls (XLU) + masked MACs (VPU).
        acc = inp * w_ref[pl.ds(3, 1), :] + b_ref[...]           # centre tap
        for d in (-3, -2, -1, 1, 2, 3):
            shifted = pltpu.roll(inp, shift=(-d) % RB, axis=0)   # row r <- row r+d
            acc = acc + jnp.where(valid[d], shifted, 0.0) * w_ref[pl.ds(d + 3, 1), :]
        return acc

    # dwconv1 (+ folded BN)
    y = dwconv7(x, dw1_w_ref, dw1_b_ref)

    # f1 | f2 fused: one (RB, L) @ (L, 2*NE) MXU pass; split at NE is a
    # multiple of 128 lanes -> no relayout copy.
    u = jnp.dot(y, f12_w_ref[...], preferred_element_type=jnp.float32) + f12_b_ref[...]
    z = jnp.clip(u[:, :NE], 0.0, 6.0) * u[:, NE:]                # relu6(x1) * x2

    # g: 1x1 conv (+ folded BN), block-diagonal over the packed columns
    gz = jnp.dot(z, g_w_ref[...], preferred_element_type=jnp.float32) + g_b_ref[...]

    # dwconv2 (bias, no BN) + residual
    o_ref[...] = (x + dwconv7(gz, dw2_w_ref, dw2_b_ref)).astype(o_ref.dtype)


# ------------------------------ JAX wrapper -------------------------------- #

def _fold_bn(w, b, gamma, beta, mean, var, eps=_EPS):
    """Fold eval-mode BatchNorm2d into the preceding conv (per output channel)."""
    scale = gamma / jnp.sqrt(var + eps)
    return w * scale[None, :], (b - mean) * scale + beta


def block_forward(x_nchw, p, *, tpc_cols=None):
    B, C, H, W = x_nchw.shape
    E = p["f1_w"].shape[1]

    # ---- lane packing: k independent image columns share the 128 lanes ----
    k = _LANE // C if (C < _LANE and _LANE % C == 0) else 1
    L = k * C

    # Pad E so the packed f1|f2 split boundary (NE) lands on a 128-lane tile.
    step = _LANE // math.gcd(k, _LANE)
    E_pad = ((E + step - 1) // step) * step
    NE = k * E_pad                                # multiple of 128

    ncols = B * W
    ncols_k = ((ncols + k - 1) // k) * k
    npc = ncols_k // k                            # packed super-columns

    # ---- rows per grid step ----
    if tpc_cols is None:
        target_rows = 2048                        # fill the MXU M-dim / amortise step cost
        tpc = max(1, target_rows // max(H, 1))
        if npc >= 4:
            tpc = min(tpc, max(1, npc // 4))      # >= 4 grid steps (2 per v7x TC)
        tpc = min(tpc, npc)
        # keep per-step live f32 set well under the v7x scoped-VMEM budget
        per_row_bytes = 4 * (6 * L + 3 * NE)      # in/out dbufs + y + u + z + gz
        max_tpc_vmem = max(1, (24 * 1024 * 1024) // (per_row_bytes * max(H, 1)))
        tpc = min(tpc, max_tpc_vmem)
    else:
        tpc = tpc_cols
    # (8,128) constraint: when there is more than one block, RB must be %8==0.
    if pl.cdiv(npc, tpc) > 1 and (tpc * H) % 8 != 0:
        mult = 8 // math.gcd(H, 8)
        tpc = ((tpc + mult - 1) // mult) * mult
    n_blocks = pl.cdiv(npc, tpc)
    npc_pad = n_blocks * tpc
    RB = tpc * H

    # ---- NCHW -> packed (rows, L) slab: channels (x k columns) on lanes,
    #      conv axis H on sublanes ----
    # TODO(synk): when Blocks are stacked in a stage, keep this packed slab
    # between blocks and do the transpose/pad once per stage, not per block.
    xc = jnp.transpose(x_nchw, (0, 3, 2, 1)).reshape(ncols, H, C)
    if ncols_k != ncols:
        xc = jnp.pad(xc, ((0, ncols_k - ncols), (0, 0), (0, 0)))
    x2d = xc.reshape(npc, k, H, C).transpose(0, 2, 1, 3).reshape(npc * H, L)
    if npc_pad != npc:
        x2d = jnp.pad(x2d, ((0, (npc_pad - npc) * H), (0, 0)))

    # ---- weights: fold BN, pad E, block-diagonalise for lane packing ----
    dw1_w, dw1_b = _fold_bn(p["dw1_w"], p["dw1_b"],
                            p["bn1_g"], p["bn1_b"], p["bn1_m"], p["bn1_v"])
    g_w, g_b = _fold_bn(p["g_w"], p["g_b"],
                        p["bng_g"], p["bng_b"], p["bng_m"], p["bng_v"])

    f1_wp = jnp.pad(p["f1_w"], ((0, 0), (0, E_pad - E)))
    f2_wp = jnp.pad(p["f2_w"], ((0, 0), (0, E_pad - E)))
    f1_bp = jnp.pad(p["f1_b"], (0, E_pad - E))
    f2_bp = jnp.pad(p["f2_b"], (0, E_pad - E))
    g_wp = jnp.pad(g_w, ((0, E_pad - E), (0, 0)))

    eye = jnp.eye(k, dtype=jnp.float32)
    bd = lambda w: jnp.kron(eye, w)               # block-diag, one block per packed column
    f12_w = jnp.concatenate([bd(f1_wp), bd(f2_wp)], axis=1)      # (L, 2*NE)
    f12_b = jnp.concatenate([jnp.tile(f1_bp, k), jnp.tile(f2_bp, k)])[None, :]
    g_bd = bd(g_wp)                                              # (NE, L)
    g_bb = jnp.tile(g_b, k)[None, :]

    dw1_wt = jnp.tile(dw1_w, (1, k));  dw1_bt = jnp.tile(dw1_b, k)[None, :]
    dw2_wt = jnp.tile(p["dw2_w"], (1, k)); dw2_bt = jnp.tile(p["dw2_b"], k)[None, :]

    weights = (dw1_wt, dw1_bt, f12_w, f12_b, g_bd, g_bb, dw2_wt, dw2_bt)
    full = lambda a: pl.BlockSpec(a.shape, lambda i: (0,) * a.ndim)

    out2d = pl.pallas_call(
        functools.partial(_block_kernel, H=H, NE=NE),
        out_shape=jax.ShapeDtypeStruct((npc_pad * H, L), jnp.float32),
        grid=(n_blocks,),
        in_specs=[pl.BlockSpec((RB, L), lambda i: (i, 0))]
                 + [full(w) for w in weights],
        out_specs=pl.BlockSpec((RB, L), lambda i: (i, 0)),
        compiler_params=pltpu.CompilerParams(
            dimension_semantics=("parallel",),
            vmem_limit_bytes=48 * 1024 * 1024),
    )(x2d, *weights)

    # ---- unpack back to NCHW ----
    out = out2d[:npc * H].reshape(npc, H, k, C).transpose(0, 2, 1, 3)
    out = out.reshape(ncols_k, H, C)[:ncols].reshape(B, W, H, C)
    return jnp.transpose(out, (0, 3, 2, 1))


# ------------------------- parameter construction -------------------------- #

def make_params(key, dim, mlp_ratio=3):
    ks = jax.random.split(key, 18)
    E = mlp_ratio * dim
    rnd = lambda k, shape, s=0.1: s * jax.random.normal(k, shape, dtype=jnp.float32)

    return {
        # dwconv: Conv2d(dim, dim, (7,1), groups=dim).weight (dim,1,7,1) -> (7, dim)
        "dw1_w": rnd(ks[0], (7, dim)), "dw1_b": rnd(ks[1], (dim,)),
        # non-trivial eval-mode BN stats (exercise the folding path)
        "bn1_g": 1.0 + rnd(ks[2], (dim,)), "bn1_b": rnd(ks[3], (dim,)),
        "bn1_m": rnd(ks[4], (dim,)),
        "bn1_v": jax.random.uniform(ks[5], (dim,), jnp.float32, 0.5, 1.5),
        # f1/f2: Conv2d(dim, E, 1).weight (E,dim,1,1), transposed -> (dim, E)
        "f1_w": rnd(ks[6], (dim, E)), "f1_b": rnd(ks[7], (E,)),
        "f2_w": rnd(ks[8], (dim, E)), "f2_b": rnd(ks[9], (E,)),
        # g: Conv2d(E, dim, 1) + BN
        "g_w": rnd(ks[10], (E, dim)), "g_b": rnd(ks[11], (dim,)),
        "bng_g": 1.0 + rnd(ks[12], (dim,)), "bng_b": rnd(ks[13], (dim,)),
        "bng_m": rnd(ks[14], (dim,)),
        "bng_v": jax.random.uniform(ks[15], (dim,), jnp.float32, 0.5, 1.5),
        # dwconv2: depthwise (7,1), bias, no BN
        "dw2_w": rnd(ks[16], (7, dim)), "dw2_b": rnd(ks[17], (dim,)),
    }


# ------------------------------ reference ---------------------------------- #

def block_reference(x, p, eps=_EPS):
    """Pure-JAX NCHW reference mirroring the PyTorch forward (eval-mode BN), f32."""
    B, C, H, W = x.shape

    def dw(inp, w, b):                            # depthwise (7,1), pad (3,0)
        xp = jnp.pad(inp, ((0, 0), (0, 0), (3, 3), (0, 0)))
        out = sum(w[k][None, :, None, None] * xp[:, :, k:k + H, :] for k in range(7))
        return out + b[None, :, None, None]

    def pw(inp, w, b):                            # 1x1 conv
        o = jnp.einsum("bchw,cd->bdhw", inp, w, preferred_element_type=jnp.float32)
        return o + b[None, :, None, None]

    def bn(t, g, b, m, v):                        # eval-mode BatchNorm2d
        inv = (g / jnp.sqrt(v + eps))[None, :, None, None]
        return (t - m[None, :, None, None]) * inv + b[None, :, None, None]

    y = bn(dw(x, p["dw1_w"], p["dw1_b"]),
           p["bn1_g"], p["bn1_b"], p["bn1_m"], p["bn1_v"])
    x1 = pw(y, p["f1_w"], p["f1_b"])
    x2 = pw(y, p["f2_w"], p["f2_b"])
    z = jnp.clip(x1, 0.0, 6.0) * x2
    gz = bn(pw(z, p["g_w"], p["g_b"]),
            p["bng_g"], p["bng_b"], p["bng_m"], p["bng_v"])
    return x + dw(gz, p["dw2_w"], p["dw2_b"])


# --------------------------------- main ------------------------------------ #

if __name__ == "__main__":
    key = jax.random.PRNGKey(0)
    k_x, k_p = jax.random.split(key)

    B, dim, H, W = 2, 32, 16, 8                  # small shapes, Block(dim=32)
    x = jax.random.normal(k_x, (B, dim, H, W), dtype=jnp.float32)
    params = make_params(k_p, dim, mlp_ratio=3)

    out = jax.block_until_ready(block_forward(x, params))
    ref = block_reference(x, params)

    assert out.shape == x.shape and out.dtype == x.dtype
    err = float(jnp.max(jnp.abs(out - ref)))
    assert err < 2e-3, f"max abs err = {err}"
    print("KERNEL_OK")
</pallas_src>

<mosaic_0001>
module attributes {stable_mosaic.version = 11 : i64} {
  func.func @_block_kernel(%arg0: i32, %arg1: memref<16x128xf32, #tpu.memory_space<vmem>>, %arg2: memref<7x128xf32, #tpu.memory_space<vmem>>, %arg3: memref<1x128xf32, #tpu.memory_space<vmem>>, %arg4: memref<128x768xf32, #tpu.memory_space<vmem>>, %arg5: memref<1x768xf32, #tpu.memory_space<vmem>>, %arg6: memref<384x128xf32, #tpu.memory_space<vmem>>, %arg7: memref<1x128xf32, #tpu.memory_space<vmem>>, %arg8: memref<7x128xf32, #tpu.memory_space<vmem>>, %arg9: memref<1x128xf32, #tpu.memory_space<vmem>>, %arg10: memref<16x128xf32, #tpu.memory_space<vmem>>) attributes {dimension_semantics = [#tpu.dimension_semantics<parallel>], iteration_bounds = array<i64: 4>, scalar_prefetch = 0 : i64, scratch_operands = 0 : i64, tpu.core_type = #tpu.core_type<tc>, window_params = [{transform_indices = @transform_0, window_bounds = array<i64: 16, 128>}, {pipeline_mode = #tpu.pipeline_mode<synchronous>, transform_indices = @transform_1, window_bounds = array<i64: 7, 128>}, {pipeline_mode = #tpu.pipeline_mode<synchronous>, transform_indices = @transform_2, window_bounds = array<i64: 1, 128>}, {pipeline_mode = #tpu.pipeline_mode<synchronous>, transform_indices = @transform_3, window_bounds = array<i64: 128, 768>}, {pipeline_mode = #tpu.pipeline_mode<synchronous>, transform_indices = @transform_4, window_bounds = array<i64: 1, 768>}, {pipeline_mode = #tpu.pipeline_mode<synchronous>, transform_indices = @transform_5, window_bounds = array<i64: 384, 128>}, {pipeline_mode = #tpu.pipeline_mode<synchronous>, transform_indices = @transform_6, window_bounds = array<i64: 1, 128>}, {pipeline_mode = #tpu.pipeline_mode<synchronous>, transform_indices = @transform_7, window_bounds = array<i64: 7, 128>}, {pipeline_mode = #tpu.pipeline_mode<synchronous>, transform_indices = @transform_8, window_bounds = array<i64: 1, 128>}, {transform_indices = @transform_9, window_bounds = array<i64: 16, 128>}]} {
    %c0 = arith.constant 0 : index
    %c0_0 = arith.constant 0 : index
    %0 = vector.load %arg1[%c0, %c0_0] : memref<16x128xf32, #tpu.memory_space<vmem>>, vector<16x128xf32>
    %1 = tpu.iota {dimensions = array<i32: 0>} : vector<16x1xi32>
    %c16_i32 = arith.constant 16 : i32
    %c0_i32 = arith.constant 0 : i32
    %2 = arith.cmpi eq, %c16_i32, %c0_i32 : i32
    %c1_i32 = arith.constant 1 : i32
    %3 = arith.select %2, %c1_i32, %c16_i32 : i32
    %4 = vector.broadcast %3 : i32 to vector<16x1xi32>
    %5 = arith.remsi %1, %4 : vector<16x1xi32>
    %c0_i32_1 = arith.constant 0 : i32
    %6 = vector.broadcast %c0_i32_1 : i32 to vector<16x1xi32>
    %7 = arith.cmpi ne, %5, %6 : vector<16x1xi32>
    %c0_i32_2 = arith.constant 0 : i32
    %8 = vector.broadcast %c0_i32_2 : i32 to vector<16x1xi32>
    %9 = arith.cmpi slt, %5, %8 : vector<16x1xi32>
    %c0_i32_3 = arith.constant 0 : i32
    %10 = arith.cmpi slt, %3, %c0_i32_3 : i32
    %11 = vector.broadcast %10 : i1 to vector<16x1xi1>
    %12 = vector.broadcast %11 : vector<16x1xi1> to vector<16x1xi1>
    %13 = arith.xori %9, %12 : vector<16x1xi1>
    %14 = arith.andi %13, %7 : vector<16x1xi1>
    %15 = vector.broadcast %3 : i32 to vector<16x1xi32>
    %16 = arith.addi %5, %15 : vector<16x1xi32>
    %17 = arith.select %14, %16, %5 : vector<16x1xi1>, vector<16x1xi32>
    %c-3_i32 = arith.constant -3 : i32
    %18 = vector.broadcast %c-3_i32 : i32 to vector<16x1xi32>
    %19 = arith.addi %17, %18 : vector<16x1xi32>
    %c0_i32_4 = arith.constant 0 : i32
    %20 = vector.broadcast %c0_i32_4 : i32 to vector<16x1xi32>
    %21 = arith.cmpi sge, %19, %20 : vector<16x1xi32>
    %c-3_i32_5 = arith.constant -3 : i32
    %22 = vector.broadcast %c-3_i32_5 : i32 to vector<16x1xi32>
    %23 = arith.addi %17, %22 : vector<16x1xi32>
    %c16_i32_6 = arith.constant 16 : i32
    %24 = vector.broadcast %c16_i32_6 : i32 to vector<16x1xi32>
    %25 = arith.cmpi slt, %23, %24 : vector<16x1xi32>
    %26 = arith.andi %21, %25 : vector<16x1xi1>
    %c-2_i32 = arith.constant -2 : i32
    %27 = vector.broadcast %c-2_i32 : i32 to vector<16x1xi32>
    %28 = arith.addi %17, %27 : vector<16x1xi32>
    %c0_i32_7 = arith.constant 0 : i32
    %29 = vector.broadcast %c0_i32_7 : i32 to vector<16x1xi32>
    %30 = arith.cmpi sge, %28, %29 : vector<16x1xi32>
    %c-2_i32_8 = arith.constant -2 : i32
    %31 = vector.broadcast %c-2_i32_8 : i32 to vector<16x1xi32>
    %32 = arith.addi %17, %31 : vector<16x1xi32>
    %c16_i32_9 = arith.constant 16 : i32
    %33 = vector.broadcast %c16_i32_9 : i32 to vector<16x1xi32>
    %34 = arith.cmpi slt, %32, %33 : vector<16x1xi32>
    %35 = arith.andi %30, %34 : vector<16x1xi1>
    %c-1_i32 = arith.constant -1 : i32
    %36 = vector.broadcast %c-1_i32 : i32 to vector<16x1xi32>
    %37 = arith.addi %17, %36 : vector<16x1xi32>
    %c0_i32_10 = arith.constant 0 : i32
    %38 = vector.broadcast %c0_i32_10 : i32 to vector<16x1xi32>
    %39 = arith.cmpi sge, %37, %38 : vector<16x1xi32>
    %c-1_i32_11 = arith.constant -1 : i32
    %40 = vector.broadcast %c-1_i32_11 : i32 to vector<16x1xi32>
    %41 = arith.addi %17, %40 : vector<16x1xi32>
    %c16_i32_12 = arith.constant 16 : i32
    %42 = vector.broadcast %c16_i32_12 : i32 to vector<16x1xi32>
    %43 = arith.cmpi slt, %41, %42 : vector<16x1xi32>
    %44 = arith.andi %39, %43 : vector<16x1xi1>
    %c1_i32_13 = arith.constant 1 : i32
    %45 = vector.broadcast %c1_i32_13 : i32 to vector<16x1xi32>
    %46 = arith.addi %17, %45 : vector<16x1xi32>
    %c0_i32_14 = arith.constant 0 : i32
    %47 = vector.broadcast %c0_i32_14 : i32 to vector<16x1xi32>
    %48 = arith.cmpi sge, %46, %47 : vector<16x1xi32>
    %c1_i32_15 = arith.constant 1 : i32
    %49 = vector.broadcast %c1_i32_15 : i32 to vector<16x1xi32>
    %50 = arith.addi %17, %49 : vector<16x1xi32>
    %c16_i32_16 = arith.constant 16 : i32
    %51 = vector.broadcast %c16_i32_16 : i32 to vector<16x1xi32>
    %52 = arith.cmpi slt, %50, %51 : vector<16x1xi32>
    %53 = arith.andi %48, %52 : vector<16x1xi1>
    %c2_i32 = arith.constant 2 : i32
    %54 = vector.broadcast %c2_i32 : i32 to vector<16x1xi32>
    %55 = arith.addi %17, %54 : vector<16x1xi32>
    %c0_i32_17 = arith.constant 0 : i32
    %56 = vector.broadcast %c0_i32_17 : i32 to vector<16x1xi32>
    %57 = arith.cmpi sge, %55, %56 : vector<16x1xi32>
    %c2_i32_18 = arith.constant 2 : i32
    %58 = vector.broadcast %c2_i32_18 : i32 to vector<16x1xi32>
    %59 = arith.addi %17, %58 : vector<16x1xi32>
    %c16_i32_19 = arith.constant 16 : i32
    %60 = vector.broadcast %c16_i32_19 : i32 to vector<16x1xi32>
    %61 = arith.cmpi slt, %59, %60 : vector<16x1xi32>
    %62 = arith.andi %57, %61 : vector<16x1xi1>
    %c3_i32 = arith.constant 3 : i32
    %63 = vector.broadcast %c3_i32 : i32 to vector<16x1xi32>
    %64 = arith.addi %17, %63 : vector<16x1xi32>
    %c0_i32_20 = arith.constant 0 : i32
    %65 = vector.broadcast %c0_i32_20 : i32 to vector<16x1xi32>
    %66 = arith.cmpi sge, %64, %65 : vector<16x1xi32>
    %c3_i32_21 = arith.constant 3 : i32
    %67 = vector.broadcast %c3_i32_21 : i32 to vector<16x1xi32>
    %68 = arith.addi %17, %67 : vector<16x1xi32>
    %c16_i32_22 = arith.constant 16 : i32
    %69 = vector.broadcast %c16_i32_22 : i32 to vector<16x1xi32>
    %70 = arith.cmpi slt, %68, %69 : vector<16x1xi32>
    %71 = arith.andi %66, %70 : vector<16x1xi1>
    %c3 = arith.constant 3 : index
    %c0_23 = arith.constant 0 : index
    %72 = vector.load %arg2[%c3, %c0_23] : memref<7x128xf32, #tpu.memory_space<vmem>>, vector<1x128xf32>
    %73 = vector.broadcast %72 : vector<1x128xf32> to vector<16x128xf32>
    %74 = arith.mulf %0, %73 : vector<16x128xf32>
    %c0_24 = arith.constant 0 : index
    %c0_25 = arith.constant 0 : index
    %75 = vector.load %arg3[%c0_24, %c0_25] : memref<1x128xf32, #tpu.memory_space<vmem>>, vector<1x128xf32>
    %76 = vector.broadcast %75 : vector<1x128xf32> to vector<16x128xf32>
    %77 = arith.addf %74, %76 : vector<16x128xf32>
    %c3_i32_26 = arith.constant 3 : i32
    %78 = tpu.dynamic_rotate %0 by %c3_i32_26 dim 0 : vector<16x128xf32>, i32 -> vector<16x128xf32>
    %cst = arith.constant 0.000000e+00 : f32
    %79 = vector.shape_cast %26 : vector<16x1xi1> to vector<16x1xi1>
    %80 = vector.broadcast %79 : vector<16x1xi1> to vector<16x128xi1>
    %81 = vector.broadcast %cst : f32 to vector<16x128xf32>
    %82 = arith.select %80, %78, %81 : vector<16x128xi1>, vector<16x128xf32>
    %c0_27 = arith.constant 0 : index
    %c0_28 = arith.constant 0 : index
    %83 = vector.load %arg2[%c0_27, %c0_28] : memref<7x128xf32, #tpu.memory_space<vmem>>, vector<1x128xf32>
    %84 = vector.broadcast %83 : vector<1x128xf32> to vector<16x128xf32>
    %85 = arith.mulf %82, %84 : vector<16x128xf32>
    %86 = arith.addf %77, %85 : vector<16x128xf32>
    %c2_i32_29 = arith.constant 2 : i32
    %87 = tpu.dynamic_rotate %0 by %c2_i32_29 dim 0 : vector<16x128xf32>, i32 -> vector<16x128xf32>
    %cst_30 = arith.constant 0.000000e+00 : f32
    %88 = vector.shape_cast %35 : vector<16x1xi1> to vector<16x1xi1>
    %89 = vector.broadcast %88 : vector<16x1xi1> to vector<16x128xi1>
    %90 = vector.broadcast %cst_30 : f32 to vector<16x128xf32>
    %91 = arith.select %89, %87, %90 : vector<16x128xi1>, vector<16x128xf32>
    %c1 = arith.constant 1 : index
    %c0_31 = arith.constant 0 : index
    %92 = vector.load %arg2[%c1, %c0_31] : memref<7x128xf32, #tpu.memory_space<vmem>>, vector<1x128xf32>
    %93 = vector.broadcast %92 : vector<1x128xf32> to vector<16x128xf32>
    %94 = arith.mulf %91, %93 : vector<16x128xf32>
    %95 = arith.addf %86, %94 : vector<16x128xf32>
    %c1_i32_32 = arith.constant 1 : i32
    %96 = tpu.dynamic_rotate %0 by %c1_i32_32 dim 0 : vector<16x128xf32>, i32 -> vector<16x128xf32>
    %cst_33 = arith.constant 0.000000e+00 : f32
    %97 = vector.shape_cast %44 : vector<16x1xi1> to vector<16x1xi1>
    %98 = vector.broadcast %97 : vector<16x1xi1> to vector<16x128xi1>
    %99 = vector.broadcast %cst_33 : f32 to vector<16x128xf32>
    %100 = arith.select %98, %96, %99 : vector<16x128xi1>, vector<16x128xf32>
    %c2 = arith.constant 2 : index
    %c0_34 = arith.constant 0 : index
    %101 = vector.load %arg2[%c2, %c0_34] : memref<7x128xf32, #tpu.memory_space<vmem>>, vector<1x128xf32>
    %102 = vector.broadcast %101 : vector<1x128xf32> to vector<16x128xf32>
    %103 = arith.mulf %100, %102 : vector<16x128xf32>
    %104 = arith.addf %95, %103 : vector<16x128xf32>
    %c15_i32 = arith.constant 15 : i32
    %105 = tpu.dynamic_rotate %0 by %c15_i32 dim 0 : vector<16x128xf32>, i32 -> vector<16x128xf32>
    %cst_35 = arith.constant 0.000000e+00 : f32
    %106 = vector.shape_cast %53 : vector<16x1xi1> to vector<16x1xi1>
    %107 = vector.broadcast %106 : vector<16x1xi1> to vector<16x128xi1>
    %108 = vector.broadcast %cst_35 : f32 to vector<16x128xf32>
    %109 = arith.select %107, %105, %108 : vector<16x128xi1>, vector<16x128xf32>
    %c4 = arith.constant 4 : index
    %c0_36 = arith.constant 0 : index
    %110 = vector.load %arg2[%c4, %c0_36] : memref<7x128xf32, #tpu.memory_space<vmem>>, vector<1x128xf32>
    %111 = vector.broadcast %110 : vector<1x128xf32> to vector<16x128xf32>
    %112 = arith.mulf %109, %111 : vector<16x128xf32>
    %113 = arith.addf %104, %112 : vector<16x128xf32>
    %c14_i32 = arith.constant 14 : i32
    %114 = tpu.dynamic_rotate %0 by %c14_i32 dim 0 : vector<16x128xf32>, i32 -> vector<16x128xf32>
    %cst_37 = arith.constant 0.000000e+00 : f32
    %115 = vector.shape_cast %62 : vector<16x1xi1> to vector<16x1xi1>
    %116 = vector.broadcast %115 : vector<16x1xi1> to vector<16x128xi1>
    %117 = vector.broadcast %cst_37 : f32 to vector<16x128xf32>
    %118 = arith.select %116, %114, %117 : vector<16x128xi1>, vector<16x128xf32>
    %c5 = arith.constant 5 : index
    %c0_38 = arith.constant 0 : index
    %119 = vector.load %arg2[%c5, %c0_38] : memref<7x128xf32, #tpu.memory_space<vmem>>, vector<1x128xf32>
    %120 = vector.broadcast %119 : vector<1x128xf32> to vector<16x128xf32>
    %121 = arith.mulf %118, %120 : vector<16x128xf32>
    %122 = arith.addf %113, %121 : vector<16x128xf32>
    %c13_i32 = arith.constant 13 : i32
    %123 = tpu.dynamic_rotate %0 by %c13_i32 dim 0 : vector<16x128xf32>, i32 -> vector<16x128xf32>
    %cst_39 = arith.constant 0.000000e+00 : f32
    %124 = vector.shape_cast %71 : vector<16x1xi1> to vector<16x1xi1>
    %125 = vector.broadcast %124 : vector<16x1xi1> to vector<16x128xi1>
    %126 = vector.broadcast %cst_39 : f32 to vector<16x128xf32>
    %127 = arith.select %125, %123, %126 : vector<16x128xi1>, vector<16x128xf32>
    %c6 = arith.constant 6 : index
    %c0_40 = arith.constant 0 : index
    %128 = vector.load %arg2[%c6, %c0_40] : memref<7x128xf32, #tpu.memory_space<vmem>>, vector<1x128xf32>
    %129 = vector.broadcast %128 : vector<1x128xf32> to vector<16x128xf32>
    %130 = arith.mulf %127, %129 : vector<16x128xf32>
    %131 = arith.addf %122, %130 : vector<16x128xf32>
    %c0_41 = arith.constant 0 : index
    %c0_42 = arith.constant 0 : index
    %132 = vector.load %arg4[%c0_41, %c0_42] : memref<128x768xf32, #tpu.memory_space<vmem>>, vector<128x768xf32>
    %cst_43 = arith.constant dense<0.000000e+00> : vector<16x768xf32>
    %133 = tpu.matmul %131, %132, %cst_43 {dimension_numbers = #tpu.dot_dimension_numbers<[1], [0], [0], [1], [0, 0, 1, 1], [], []>} : vector<16x128xf32>, vector<128x768xf32>, vector<16x768xf32> -> vector<16x768xf32>
    %c0_44 = arith.constant 0 : index
    %c0_45 = arith.constant 0 : index
    %134 = vector.load %arg5[%c0_44, %c0_45] : memref<1x768xf32, #tpu.memory_space<vmem>>, vector<1x768xf32>
    %135 = vector.broadcast %134 : vector<1x768xf32> to vector<16x768xf32>
    %136 = arith.addf %133, %135 : vector<16x768xf32>
    %137 = vector.extract_strided_slice %136 {offsets = [0, 0], sizes = [16, 384], strides = [1, 1]} : vector<16x768xf32> to vector<16x384xf32>
    %cst_46 = arith.constant 0.000000e+00 : f32
    %cst_47 = arith.constant 6.000000e+00 : f32
    %138 = vector.broadcast %cst_46 : f32 to vector<16x384xf32>
    %139 = arith.maximumf %138, %137 : vector<16x384xf32>
    %140 = vector.broadcast %cst_47 : f32 to vector<16x384xf32>
    %141 = arith.minimumf %140, %139 : vector<16x384xf32>
    %142 = vector.extract_strided_slice %136 {offsets = [0, 384], sizes = [16, 384], strides = [1, 1]} : vector<16x768xf32> to vector<16x384xf32>
    %143 = arith.mulf %141, %142 : vector<16x384xf32>
    %c0_48 = arith.constant 0 : index
    %c0_49 = arith.constant 0 : index
    %144 = vector.load %arg6[%c0_48, %c0_49] : memref<384x128xf32, #tpu.memory_space<vmem>>, vector<384x128xf32>
    %cst_50 = arith.constant dense<0.000000e+00> : vector<16x128xf32>
    %145 = tpu.matmul %143, %144, %cst_50 {dimension_numbers = #tpu.dot_dimension_numbers<[1], [0], [0], [1], [0, 0, 1, 1], [], []>} : vector<16x384xf32>, vector<384x128xf32>, vector<16x128xf32> -> vector<16x128xf32>
    %c0_51 = arith.constant 0 : index
    %c0_52 = arith.constant 0 : index
    %146 = vector.load %arg7[%c0_51, %c0_52] : memref<1x128xf32, #tpu.memory_space<vmem>>, vector<1x128xf32>
    %147 = vector.broadcast %146 : vector<1x128xf32> to vector<16x128xf32>
    %148 = arith.addf %145, %147 : vector<16x128xf32>
    %c3_53 = arith.constant 3 : index
    %c0_54 = arith.constant 0 : index
    %149 = vector.load %arg8[%c3_53, %c0_54] : memref<7x128xf32, #tpu.memory_space<vmem>>, vector<1x128xf32>
    %150 = vector.broadcast %149 : vector<1x128xf32> to vector<16x128xf32>
    %151 = arith.mulf %148, %150 : vector<16x128xf32>
    %c0_55 = arith.constant 0 : index
    %c0_56 = arith.constant 0 : index
    %152 = vector.load %arg9[%c0_55, %c0_56] : memref<1x128xf32, #tpu.memory_space<vmem>>, vector<1x128xf32>
    %153 = vector.broadcast %152 : vector<1x128xf32> to vector<16x128xf32>
    %154 = arith.addf %151, %153 : vector<16x128xf32>
    %c3_i32_57 = arith.constant 3 : i32
    %155 = tpu.dynamic_rotate %148 by %c3_i32_57 dim 0 : vector<16x128xf32>, i32 -> vector<16x128xf32>
    %cst_58 = arith.constant 0.000000e+00 : f32
    %156 = vector.shape_cast %26 : vector<16x1xi1> to vector<16x1xi1>
    %157 = vector.broadcast %156 : vector<16x1xi1> to vector<16x128xi1>
    %158 = vector.broadcast %cst_58 : f32 to vector<16x128xf32>
    %159 = arith.select %157, %155, %158 : vector<16x128xi1>, vector<16x128xf32>
    %c0_59 = arith.constant 0 : index
    %c0_60 = arith.constant 0 : index
    %160 = vector.load %arg8[%c0_59, %c0_60] : memref<7x128xf32, #tpu.memory_space<vmem>>, vector<1x128xf32>
    %161 = vector.broadcast %160 : vector<1x128xf32> to vector<16x128xf32>
    %162 = arith.mulf %159, %161 : vector<16x128xf32>
    %163 = arith.addf %154, %162 : vector<16x128xf32>
    %c2_i32_61 = arith.constant 2 : i32
    %164 = tpu.dynamic_rotate %148 by %c2_i32_61 dim 0 : vector<16x128xf32>, i32 -> vector<16x128xf32>
    %cst_62 = arith.constant 0.000000e+00 : f32
    %165 = vector.shape_cast %35 : vector<16x1xi1> to vector<16x1xi1>
    %166 = vector.broadcast %165 : vector<16x1xi1> to vector<16x128xi1>
    %167 = vector.broadcast %cst_62 : f32 to vector<16x128xf32>
    %168 = arith.select %166, %164, %167 : vector<16x128xi1>, vector<16x128xf32>
    %c1_63 = arith.constant 1 : index
    %c0_64 = arith.constant 0 : index
    %169 = vector.load %arg8[%c1_63, %c0_64] : memref<7x128xf32, #tpu.memory_space<vmem>>, vector<1x128xf32>
    %170 = vector.broadcast %169 : vector<1x128xf32> to vector<16x128xf32>
    %171 = arith.mulf %168, %170 : vector<16x128xf32>
    %172 = arith.addf %163, %171 : vector<16x128xf32>
    %c1_i32_65 = arith.constant 1 : i32
    %173 = tpu.dynamic_rotate %148 by %c1_i32_65 dim 0 : vector<16x128xf32>, i32 -> vector<16x128xf32>
    %cst_66 = arith.constant 0.000000e+00 : f32
    %174 = vector.shape_cast %44 : vector<16x1xi1> to vector<16x1xi1>
    %175 = vector.broadcast %174 : vector<16x1xi1> to vector<16x128xi1>
    %176 = vector.broadcast %cst_66 : f32 to vector<16x128xf32>
    %177 = arith.select %175, %173, %176 : vector<16x128xi1>, vector<16x128xf32>
    %c2_67 = arith.constant 2 : index
    %c0_68 = arith.constant 0 : index
    %178 = vector.load %arg8[%c2_67, %c0_68] : memref<7x128xf32, #tpu.memory_space<vmem>>, vector<1x128xf32>
    %179 = vector.broadcast %178 : vector<1x128xf32> to vector<16x128xf32>
    %180 = arith.mulf %177, %179 : vector<16x128xf32>
    %181 = arith.addf %172, %180 : vector<16x128xf32>
    %c15_i32_69 = arith.constant 15 : i32
    %182 = tpu.dynamic_rotate %148 by %c15_i32_69 dim 0 : vector<16x128xf32>, i32 -> vector<16x128xf32>
    %cst_70 = arith.constant 0.000000e+00 : f32
    %183 = vector.shape_cast %53 : vector<16x1xi1> to vector<16x1xi1>
    %184 = vector.broadcast %183 : vector<16x1xi1> to vector<16x128xi1>
    %185 = vector.broadcast %cst_70 : f32 to vector<16x128xf32>
    %186 = arith.select %184, %182, %185 : vector<16x128xi1>, vector<16x128xf32>
    %c4_71 = arith.constant 4 : index
    %c0_72 = arith.constant 0 : index
    %187 = vector.load %arg8[%c4_71, %c0_72] : memref<7x128xf32, #tpu.memory_space<vmem>>, vector<1x128xf32>
    %188 = vector.broadcast %187 : vector<1x128xf32> to vector<16x128xf32>
    %189 = arith.mulf %186, %188 : vector<16x128xf32>
    %190 = arith.addf %181, %189 : vector<16x128xf32>
    %c14_i32_73 = arith.constant 14 : i32
    %191 = tpu.dynamic_rotate %148 by %c14_i32_73 dim 0 : vector<16x128xf32>, i32 -> vector<16x128xf32>
    %cst_74 = arith.constant 0.000000e+00 : f32
    %192 = vector.shape_cast %62 : vector<16x1xi1> to vector<16x1xi1>
    %193 = vector.broadcast %192 : vector<16x1xi1> to vector<16x128xi1>
    %194 = vector.broadcast %cst_74 : f32 to vector<16x128xf32>
    %195 = arith.select %193, %191, %194 : vector<16x128xi1>, vector<16x128xf32>
    %c5_75 = arith.constant 5 : index
    %c0_76 = arith.constant 0 : index
    %196 = vector.load %arg8[%c5_75, %c0_76] : memref<7x128xf32, #tpu.memory_space<vmem>>, vector<1x128xf32>
    %197 = vector.broadcast %196 : vector<1x128xf32> to vector<16x128xf32>
    %198 = arith.mulf %195, %197 : vector<16x128xf32>
    %199 = arith.addf %190, %198 : vector<16x128xf32>
    %c13_i32_77 = arith.constant 13 : i32
    %200 = tpu.dynamic_rotate %148 by %c13_i32_77 dim 0 : vector<16x128xf32>, i32 -> vector<16x128xf32>
    %cst_78 = arith.constant 0.000000e+00 : f32
    %201 = vector.shape_cast %71 : vector<16x1xi1> to vector<16x1xi1>
    %202 = vector.broadcast %201 : vector<16x1xi1> to vector<16x128xi1>
    %203 = vector.broadcast %cst_78 : f32 to vector<16x128xf32>
    %204 = arith.select %202, %200, %203 : vector<16x128xi1>, vector<16x128xf32>
    %c6_79 = arith.constant 6 : index
    %c0_80 = arith.constant 0 : index
    %205 = vector.load %arg8[%c6_79, %c0_80] : memref<7x128xf32, #tpu.memory_space<vmem>>, vector<1x128xf32>
    %206 = vector.broadcast %205 : vector<1x128xf32> to vector<16x128xf32>
    %207 = arith.mulf %204, %206 : vector<16x128xf32>
    %208 = arith.addf %199, %207 : vector<16x128xf32>
    %209 = arith.addf %0, %208 : vector<16x128xf32>
    %c0_81 = arith.constant 0 : index
    %c0_82 = arith.constant 0 : index
    %210 = vector.load %arg10[%c0_81, %c0_82] : memref<16x128xf32, #tpu.memory_space<vmem>>, vector<16x128xf32>
    tpu.vector_store %arg10[%c0_81, %c0_82], %209 {strides = array<i32>} : memref<16x128xf32, #tpu.memory_space<vmem>>, vector<16x128xf32>,
    return
  }
  func.func @transform_0(%arg0: i32) -> (i32, i32) {
    %c0_i32 = arith.constant 0 : i32
    %c0_i32_0 = arith.constant 0 : i32
    return %arg0, %c0_i32 : i32, i32
  }
  func.func @transform_1(%arg0: i32) -> (i32, i32) {
    %c0_i32 = arith.constant 0 : i32
    %c0_i32_0 = arith.constant 0 : i32
    %c0_i32_1 = arith.constant 0 : i32
    return %c0_i32, %c0_i32_0 : i32, i32
  }
  func.func @transform_2(%arg0: i32) -> (i32, i32) {
    %c0_i32 = arith.constant 0 : i32
    %c0_i32_0 = arith.constant 0 : i32
    %c0_i32_1 = arith.constant 0 : i32
    return %c0_i32, %c0_i32_0 : i32, i32
  }
  func.func @transform_3(%arg0: i32) -> (i32, i32) {
    %c0_i32 = arith.constant 0 : i32
    %c0_i32_0 = arith.constant 0 : i32
    %c0_i32_1 = arith.constant 0 : i32
    return %c0_i32, %c0_i32_0 : i32, i32
  }
  func.func @transform_4(%arg0: i32) -> (i32, i32) {
    %c0_i32 = arith.constant 0 : i32
    %c0_i32_0 = arith.constant 0 : i32
    %c0_i32_1 = arith.constant 0 : i32
    return %c0_i32, %c0_i32_0 : i32, i32
  }
  func.func @transform_5(%arg0: i32) -> (i32, i32) {
    %c0_i32 = arith.constant 0 : i32
    %c0_i32_0 = arith.constant 0 : i32
    %c0_i32_1 = arith.constant 0 : i32
    return %c0_i32, %c0_i32_0 : i32, i32
  }
  func.func @transform_6(%arg0: i32) -> (i32, i32) {
    %c0_i32 = arith.constant 0 : i32
    %c0_i32_0 = arith.constant 0 : i32
    %c0_i32_1 = arith.constant 0 : i32
    return %c0_i32, %c0_i32_0 : i32, i32
  }
  func.func @transform_7(%arg0: i32) -> (i32, i32) {
    %c0_i32 = arith.constant 0 : i32
    %c0_i32_0 = arith.constant 0 : i32
    %c0_i32_1 = arith.constant 0 : i32
    return %c0_i32, %c0_i32_0 : i32, i32
  }
  func.func @transform_8(%arg0: i32) -> (i32, i32) {
    %c0_i32 = arith.constant 0 : i32
    %c0_i32_0 = arith.constant 0 : i32
    %c0_i32_1 = arith.constant 0 : i32
    return %c0_i32, %c0_i32_0 : i32, i32
  }
  func.func @transform_9(%arg0: i32) -> (i32, i32) {
    %c0_i32 = arith.constant 0 : i32
    %c0_i32_0 = arith.constant 0 : i32
    return %arg0, %c0_i32 : i32, i32
  }
}

</mosaic_0001>

<bundles_post_ra>
// kernel: tpu_custom_call.1
= control target key start
LH: loop header
LB: loop body
LE: loop exit
PB: predicated region body
PF: predicated region fallthrough
CT: control target
= control target key end

     0   :  { %s2558_s0 = inlined_call_operand.hbm [shape: f32[64,128], index: 0, kind: input, shape index: {}]   ;;  %s2559_s1 = inlined_call_operand.hbm [shape: f32[7,128], index: 1, kind: input, shape index: {}]   ;;  %s2560_s2 = inlined_call_operand.vmem [shape: f32[1,128], index: 2, kind: input, shape index: {}]   ;;  %s2561_s3 = inlined_call_operand.hbm [shape: f32[128,768], index: 3, kind: input, shape index: {}]   ;;  %s2562_s4 = inlined_call_operand.vmem [shape: f32[1,768], index: 4, kind: input, shape index: {}]   ;;  %s2563_s5 = inlined_call_operand.hbm [shape: f32[384,128], index: 5, kind: input, shape index: {}]   ;;  %s2564_s6 = inlined_call_operand.vmem [shape: f32[1,128], index: 6, kind: input, shape index: {}]   ;;  %s2565_s7 = inlined_call_operand.vmem [shape: f32[7,128], index: 7, kind: input, shape index: {}]   ;;  %s2566_s8 = inlined_call_operand.vmem [shape: f32[1,128], index: 8, kind: input, shape index: {}]   ;;  %s2567_s9 = inlined_call_operand.hbm [shape: f32[64,128], index: 9, kind: output, shape index: {}]  }
   0x1   :  { %2573 = sst [smem:[#allocation16_spill]] %s2559_s1 }
   0x2   :  { %14 = vsyncpa [#allocation3], 0 }
   0x3   :  { %16 = vsyncpa [#allocation3 + $0x1], 0 }
   0x4   :  { %17 = vsyncpa [#allocation6], 0 }
   0x5   :  { %18 = vsyncpa [#allocation9], 0 }
   0x6   :  { %19 = vsyncpa [#allocation4], 0 }
   0x7   :  { %21 = vsyncpa [#allocation4 + $0x1], 0  ;;  %s2042_s30 = smov 0   ;;  %s2044_s10 = smov 0  }
   0x8   :  { %s2046_s11 = smov 0   ;;  %s2048_s12 = smov 0  }
   0x9 LB: > { %s2063_s13 = sadd.s32 4294967295, %s1978_s12   ;;  %s1416_s14 = sadd.s32 4294967294, %s1978_s12   ;;  %s1978_s12 = sphi %s2048_s12, %s2596_s12   ;;  %s1974_s11 = sphi %s2046_s11, %s2595_s11   ;;  %s1970_s10 = sphi %s2044_s10, %s2594_s10   ;;  %s1966_s30 = sphi %s2042_s30, %s2593_s30  }
   0xa   : > { %p47_p0 = scmp.ne.s32.totalorder %s1970_s10, %s1966_s30  ;;  %p2568_p1 = scmp.eq.s32.totalorder %s2063_s13, 0 }
   0xb   : > { %p245_p3 = scmp.eq.s32.totalorder %s1416_s14, 3  ;;  %p1417_p5 = scmp.ge.s32.totalorder %s1978_s12, 1 }
   0xc   : > { %p2072_p4 = por %p2568_p1, %p47_p0  ;;  %p252_p7 = scmp.lt.s32.totalorder %s1978_s12, 5 }
   0xd   : > { %p2077_p6 = por %p245_p3, %p47_p0  ;;  %s1980_s18 = smov [#allocation5]  }
   0xe   : > { %s2574_s15 = scalar_select %p2072_p4, 1, 0 }
   0xf   : > { %s2575_s16 = scalar_select %p2077_p6, 1, 0 }
  0x10   : > { %p2082_p8 = pnand %p1417_p5, %p252_p7  ;;  %s265_s19 = sshll.u32 %s1980_s18, 4  ;;  %s266_s19 = int_to_ptr.vmem [resolvable:$true] %s265_s19 }
  0x11   : > { %2576 = sst [smem:[#allocation15_spill]] %s2575_s16  ;;  %s1981_s20 = smov [#allocation7]  }
  0x12   : > { %s2577_s17 = scalar_select %p2082_p8, 1, 0 }
  0x13   : > { %p1722_p9 = pneg %p2082_p8  ;;  %s278_s21 = sshll.u32 %s1981_s20, 4  ;;  %s2094_s21 = int_to_ptr.vmem [resolvable:$true] %s278_s21 }
  0x14   : > { %s1982_s23 = smov [#allocation8]   ;;  %s2579_s1 = sld [smem:[#allocation16_spill]] }
  0x15   : > { %p2090_p10 = pnand %p1722_p9, %p2568_p1  ;;  %s2096_s24 = sshll.u32 %s1982_s23, 4  ;;  %s295_s24 = int_to_ptr.vmem [resolvable:$true] %s2096_s24 }
  0x17   : > { %p2106_p12 = pneg %p2090_p10 }
  0x1a   : > { %s1790_s27 = scalar_lea.hbm %s2579_s1, 128 }
  0x1b   : > { %p1791_p11 = scmp.ne.s32.totalorder %s2579_s1, %s1790_s27  ;;  %p1797_p3 = scmp.lt.u32.totalorder %s1790_s27, %s2579_s1 }
  0x1d   : > { %p1793_p13 = pnand %p2106_p12, %p1791_p11 }
  0x1f   : > { %p1794_p0 = pneg %p1793_p13 }
  0x21   : > { %p1799_p5 = pnand %p1797_p3, %p1794_p0 }
  0x23   : > { %1802 = shalt.err (!%p1799_p5)
}
  0x24   : > { %s1803_s23 = scalar_lea.vmem %s266_s19, 128  ;;  %p1811_p2 = scmp.lt.s32.totalorder %s266_s19, %s266_s19 }
  0x25   : > { %p1804_p7 = scmp.ne.s32.totalorder %s266_s19, %s1803_s23  ;;  %p1812_p6 = scmp.lt.s32.totalorder %s1803_s23, %s1803_s23 }
  0x27   : > { %p1806_p9 = pnand %p1804_p7, %p2106_p12  ;;  %p1813_p4 = por %p1812_p6, %p1811_p2 }
  0x29   : > { %p1807_p1 = pneg %p1806_p9 }
  0x2b   : > { %p1814_p8 = pnand %p1813_p4, %p1807_p1 }
  0x2d   : > { %1817 = shalt.err (!%p1814_p8)
}
  0x2e   : > { %1725 = dma.hbm_to_vmem [thread:$0]  (!%p2090_p10), %s2579_s1, 128, %s266_s19, [#allocation6]  }
  0x2f   : > { %s1818_s29 = scalar_lea.hbm %s2561_s3, 12288 }
  0x30   : > { %p1819_p11 = scmp.ne.s32.totalorder %s2561_s3, %s1818_s29  ;;  %p1825_p1 = scmp.lt.u32.totalorder %s1818_s29, %s2561_s3 }
  0x32   : > { %p1821_p13 = pnand %p1819_p11, %p2106_p12 }
  0x34   : > { %p1822_p2 = pneg %p1821_p13 }
  0x36   : > { %p1827_p4 = pnand %p1825_p1, %p1822_p2 }
  0x38   : > { %1830 = shalt.err (!%p1827_p4)
}
  0x39   : > { %s1831_s19 = scalar_lea.vmem %s2094_s21, 12288  ;;  %p1839_p3 = scmp.lt.s32.totalorder %s2094_s21, %s2094_s21 }
  0x3a   : > { %p1832_p6 = scmp.ne.s32.totalorder %s2094_s21, %s1831_s19  ;;  %p1840_p5 = scmp.lt.s32.totalorder %s1831_s19, %s1831_s19 }
  0x3c   : > { %p1834_p8 = pnand %p1832_p6, %p2106_p12  ;;  %p1841_p7 = por %p1840_p5, %p1839_p3 }
  0x3e   : > { %p1835_p0 = pneg %p1834_p8 }
  0x40   : > { %p1842_p9 = pnand %p1841_p7, %p1835_p0 }
  0x42   : > { %1845 = shalt.err (!%p1842_p9)
}
  0x43   : > { %s1983_s25 = smov 768   ;;  %s1984_s16 = smov 48  }
  0x44   : > { %1728 = dma.hbm_to_vmem [thread:$0]  (!%p2090_p10), %s2561_s3, 12288, %s2094_s21, [#allocation6], %s1983_s25, %s1983_s25, %s1984_s16  }
  0x45   : > { %s1846_s18 = scalar_lea.hbm %s2563_s5, 6144 }
  0x46   : > { %p1847_p11 = scmp.ne.s32.totalorder %s2563_s5, %s1846_s18  ;;  %p1853_p1 = scmp.lt.u32.totalorder %s1846_s18, %s2563_s5 }
  0x48   : > { %p1849_p13 = pnand %p1847_p11, %p2106_p12 }
  0x4a   : > { %p1850_p2 = pneg %p1849_p13 }
  0x4c   : > { %p1855_p4 = pnand %p1853_p1, %p1850_p2 }
  0x4e   : > { %1858 = shalt.err (!%p1855_p4)
}
  0x4f   : > { %s1859_s26 = scalar_lea.vmem %s295_s24, 6144  ;;  %p1867_p3 = scmp.lt.s32.totalorder %s295_s24, %s295_s24 }
  0x50   : > { %p1860_p6 = scmp.ne.s32.totalorder %s295_s24, %s1859_s26  ;;  %p1868_p5 = scmp.lt.s32.totalorder %s1859_s26, %s1859_s26 }
  0x52   : > { %p1862_p8 = pnand %p1860_p6, %p2106_p12  ;;  %p1869_p7 = por %p1868_p5, %p1867_p3 }
  0x54   : > { %p1863_p0 = pneg %p1862_p8 }
  0x56   : > { %p1870_p9 = pnand %p1869_p7, %p1863_p0 }
  0x58   : > { %1873 = shalt.err (!%p1870_p9)
}
  0x59   : > { %s2572_s21 = smov 128   ;;  %s1986_s1 = smov 8  }
  0x5a   : > { %1731 = dma.hbm_to_vmem [thread:$0]  (!%p2090_p10), %s2563_s5, 6144, %s295_s24, [#allocation9], %s2572_s21, %s2572_s21, %s1986_s1  }
  0x5b   : > { %s2168_s16 = sadd.s32 1, %s1978_s12   ;;  %s34_s28 = sadd.s32 1, %s1974_s11 }
  0x5c   : > { %s31_s27 = ssub.s32 %s1978_s12, %s2168_s16  ;;  %p41_p11 = scmp.ne.s32.totalorder %s1974_s11, %s1970_s10 }
  0x5d   : > { %p32_p12 = scmp.eq.s32.totalorder %s31_s27, 0  ;;  %p42_p13 = scmp.eq.s32.totalorder %s1978_s12, 0 }
  0x5e   : > { %p1743_p2 = scmp.lt.s32.totalorder %s1978_s12, 4  ;;  %p2581_p4 = scmp.eq.s32.totalorder %s2063_s13, 3 }
  0x5f   : > { %s2178_s29 = scalar_select %p32_p12, %s1974_s11, %s34_s28  }
  0x60   : > { %p43_p1 = por %p42_p13, %p41_p11  ;;  %p2182_p6 = por %p2581_p4, %p41_p11 }
  0x61   : > { %s317_s18 = sand.u32 1, %s1974_s11   ;;  %s1453_s20 = sshll.u32 %s1978_s12, 8 }
  0x62   : > { %s1422_s24 = sshll.u32 %s317_s18, 4  ;;  %s2191_s26 = scalar_lea.hbm %s2558_s0, %s1453_s20 }
  0x63   : > { %s321_s14 = scalar_lea.vmem [#allocation2], %s1422_s24  ;;  %p2193_p10 = pnand %p1743_p2, %p43_p1 }
  0x64   : > { %s328_s25 = sshll.u32 %s321_s14, 4  ;;  %s2199_s28 = scalar_lea.sflag [#allocation3], %s317_s18  ;;  %s2197_s25 = int_to_ptr.vmem [resolvable:$true] %s328_s25 }
  0x65   : > { %s1874_s21 = scalar_lea.hbm %s2191_s26, 256  ;;  %p1876_p0 = pneg %p2193_p10 }
  0x66   : > { %p1875_p8 = scmp.ne.s32.totalorder %s2191_s26, %s1874_s21  ;;  %s1879_s23 = scalar_lea.hbm %s2558_s0, 1024 }
  0x67   : > { %p1880_p7 = scmp.lt.u32.totalorder %s2191_s26, %s2558_s0  ;;  %p1881_p9 = scmp.lt.u32.totalorder %s1879_s23, %s1874_s21 }
  0x68   : > { %p1877_p3 = pnand %p1876_p0, %p1875_p8  ;;  %p1883_p11 = scmp.lt.u32.totalorder %s1874_s21, %s2191_s26 }
  0x69   : > { %p1882_p12 = por %p1881_p9, %p1880_p7 }
  0x6a   : > { %p1878_p5 = pneg %p1877_p3 }
  0x6b   : > { %p1884_p13 = por %p1883_p11, %p1882_p12 }
  0x6d   : > { %p1885_p2 = pnand %p1884_p13, %p1878_p5 }
  0x6f   : > { %1888 = shalt.err (!%p1885_p2)
}
  0x70   : > { %s1889_s18 = scalar_lea.vmem %s2197_s25, 256  ;;  %s1987_s20 = smov [#allocation2]  }
  0x71   : > { %p1890_p1 = scmp.ne.s32.totalorder %s2197_s25, %s1889_s18  ;;  %s1894_s24 = sshll.u32 %s1987_s20, 4  ;;  %s1895_s24 = int_to_ptr.vmem [resolvable:$false] %s1894_s24 }
  0x72   : > { %s1896_s19 = scalar_lea.vmem %s1895_s24, 512  ;;  %p1897_p3 = scmp.lt.s32.totalorder %s2197_s25, %s1895_s24 }
  0x73   : > { %p1892_p4 = pnand %p1890_p1, %p1876_p0  ;;  %p1898_p7 = scmp.lt.s32.totalorder %s1896_s19, %s1889_s18 }
  0x75   : > { %p1893_p8 = pneg %p1892_p4  ;;  %p1899_p9 = por %p1898_p7, %p1897_p3 }
  0x77   : > { %p1900_p12 = pnand %p1899_p9, %p1893_p8 }
  0x79   : > { %1903 = shalt.err (!%p1900_p12)
}
  0x7a   : > { %s2584_s21 = smov 128   ;;  %p2585_p0 = scmp.ne.s32.totalorder %s2577_s17, 0 }
  0x7b   : > { %1735 = dma.hbm_to_vmem [thread:$0]  (!%p2193_p10), %s2191_s26, 256, %s2197_s25, %s2199_s28, %s2584_s21, %s2584_s21, %s1986_s1  }
  0x7c   : > { %340 = sbr.rel (%p2585_p0) target bundleno = 684 (0x2ac), region = 56  ;;  %s2233_s23 = sand.u32 (!%p2585_p0), 1, %s1970_s10  }
  0x7d   : > { %s1426_s14 = sshll.u32 (!%p2585_p0), %s2233_s23, 4  ;;  %s343_s18 = scalar_lea.sflag (!%p2585_p0), [#allocation3], %s2233_s23 }
  0x7e   : > { %s2239_s27 = scalar_lea.vmem (!%p2585_p0), [#allocation2], %s1426_s14  ;;  %p2586_p5 = scmp.ne.s32.totalorder (!%p2585_p0), %s2574_s15, 0 }
  0x83   : > { %1949 = dma.done.wait (%p2586_p5), %s343_s18, 256  }
  0x84   : > { %1951 = vsyncadd (%p2586_p5), %s343_s18, 4294967040  ;;  %p2587_p10 = scmp.eq.s32.totalorder %s2063_s13, 0 }
  0x86   : > { %1953 = dma.done.wait (%p2587_p10), [#allocation6], 12416   ;;  %p2588_p11 = pmov %p2587_p10 }
  0x87   : > { %p2589_p13 = pmov %p2587_p10 }
  0x88   : > { %1955 = vsyncadd (%p2588_p11), [#allocation6], 4294954880 }
  0x89   : > { %1957 = dma.done.wait (%p2589_p13), [#allocation9], 6144   ;;  %p2590_p2 = pmov %p2587_p10 }
  0x8a   : > { %v1988_v0 = vmov 0.0   ;;  %v609_v1 = vld [vmem:[#allocation7 + $0x8] sm:$0xff]  ;;  %v615_v2 = vld [vmem:[#allocation7 + $0x38] sm:$0xff]  ;;  %v608_v3 = vld [vmem:[#allocation7] sm:$0xff]  ;;  %v397_v13 = vlaneseq  ;;  %s1454_s18 = sshll.u32 %s2063_s13, 8  ;;  %s1301_s13 = scalar_lea.sflag [#allocation4], %s2233_s23 }
  0x8b   : > { %1959 = vsyncadd (%p2590_p2), [#allocation9], 4294961152  ;;  %800 = vmatprep.mubr.f32.mxu0 %v1988_v0  ;;  %877 = vmatprep.mubr.f32.mxu1 %v1988_v0  ;;  %v1546_v4 = vpack.c.bf16 %v615_v2, %v609_v1  ;;  %v614_v5 = vld [vmem:[#allocation7 + $0x30] sm:$0xff]  ;;  %v621_v6 = vld [vmem:[#allocation7 + $0x68] sm:$0xff]  ;;  %s2512_s26 = scalar_lea.hbm %s2567_s9, %s1454_s18  ;;  %s1989_s25 = smov [#allocation10]  }
  0x8c   : > { %v627_v7 = vld [vmem:[#allocation7 + $0x98] sm:$0xff]  ;;  %v1548_v8 = vpack.c.bf16 %v614_v5, %v608_v3  ;;  %v617_v11 = vld [vmem:[#allocation7 + $0x48] sm:$0xff]  ;;  %v620_v12 = vld [vmem:[#allocation7 + $0x60] sm:$0xff]  ;;  %v2255_v31 = vshrl.u32 %v397_v13, 7  ;;  %s1908_s28 = sshll.u32 %s1989_s25, 4  ;;  %s1909_s28 = int_to_ptr.vmem [resolvable:$false] %s1908_s28 }
  0x8d   : > { %v1550_v9 = vpack.c.bf16 %v627_v7, %v621_v6  ;;  %v611_v10 = vld [vmem:[#allocation7 + $0x18] sm:$0xff]  ;;  %1547 = vmatprep.subr.bf16.mxu0 %v1546_v4  ;;  %v626_v15 = vld [vmem:[#allocation7 + $0x90] sm:$0xff]  ;;  %v616_v17 = vld [vmem:[#allocation7 + $0x40] sm:$0xff]  ;;  %s1910_s20 = scalar_lea.vmem %s1909_s28, 512 }
  0x8e   : > { %v1578_v14 = vpack.c.bf16 %v617_v11, %v611_v10  ;;  %v610_v16 = vld [vmem:[#allocation7 + $0x10] sm:$0xff]  ;;  %1549 = vmatpush1.bf16.msra.mxu0 %v1548_v8  ;;  %v1552_v18 = vpack.c.bf16 %v626_v15, %v620_v12  ;;  %v633_v20 = vld [vmem:[#allocation7 + $0xc8] sm:$0xff]  ;;  %v639_v21 = vld [vmem:[#allocation7 + $0xf8] sm:$0xff]  ;;  %v404_v48 = vand.u32 15, %v2255_v31  ;;  %v399_v5 = vadd.s32 8, %v2255_v31 }
  0x8f   : > { %v1580_v19 = vpack.c.bf16 %v616_v17, %v610_v16  ;;  %v623_v22 = vld [vmem:[#allocation7 + $0x78] sm:$0xff]  ;;  %1551 = vmatprep.subr.bf16.mxu0 %v1550_v9  ;;  %v1554_v23 = vpack.c.bf16 %v639_v21, %v633_v20  ;;  %v629_v24 = vld [vmem:[#allocation7 + $0xa8] sm:$0xff]  ;;  %v632_v25 = vld [vmem:[#allocation7 + $0xc0] sm:$0xff]  ;;  %vm490_vm0 = vcmp.lt.s32.totalorder %v2255_v31, 3  ;;  %vm510_vm1 = vcmp.lt.s32.totalorder %v2255_v31, 2 }
  0x90   : > { %1579 = vmatprep.subr.bf16.mxu1 %v1578_v14  ;;  %v638_v26 = vld [vmem:[#allocation7 + $0xf0] sm:$0xff]  ;;  %v1582_v27 = vpack.c.bf16 %v629_v24, %v623_v22  ;;  %v628_v29 = vld [vmem:[#allocation7 + $0xa0] sm:$0xff]  ;;  %v645_v30 = vld [vmem:[#allocation7 + $0x128] sm:$0xff]  ;;  %v2264_v3 = vadd.s32 4294967293, %v404_v48  ;;  %v2266_v4 = vadd.s32 4294967294, %v404_v48  ;;  %v2271_v10 = vadd.s32 4294967295, %v404_v48 }
  0x91   : > { %1581 = vmatpush1.bf16.msra.mxu1 %v1580_v19  ;;  %v622_v28 = vld [vmem:[#allocation7 + $0x70] sm:$0xff]  ;;  %v651_v33 = vld [vmem:[#allocation7 + $0x158] sm:$0xff]  ;;  %v641_v35 = vld [vmem:[#allocation7 + $0x108] sm:$0xff]  ;;  %v1556_v36 = vpack.c.bf16 %v638_v26, %v632_v25  ;;  %vm530_vm2 = vcmp.lt.s32.totalorder %v2255_v31, 1  ;;  %vm550_vm3 = vcmp.lt.s32.totalorder %v2255_v31, 7  ;;  %vm570_vm4 = vcmp.lt.s32.totalorder %v2255_v31, 6 }
  0x92   : > { %v1584_v32 = vpack.c.bf16 %v628_v29, %v622_v28  ;;  %v635_v34 = vld [vmem:[#allocation7 + $0xd8] sm:$0xff]  ;;  %1553 = vmatpush1.bf16.msra.mxu0 %v1552_v18  ;;  %1583 = vmatprep.subr.bf16.mxu1 %v1582_v27  ;;  %v644_v38 = vld [vmem:[#allocation7 + $0x120] sm:$0xff]  ;;  %v634_v39 = vld [vmem:[#allocation7 + $0xd0] sm:$0xff]  ;;  %v1558_v40 = vpack.c.bf16 %v651_v33, %v645_v30  ;;  %vm426_vm5 = vcmp.ge.s32.totalorder %v2264_v3, 0  ;;  %vm434_vm6 = vcmp.ge.s32.totalorder %v2266_v4, 0 }
  0x93   : > { %v1586_v37 = vpack.c.bf16 %v641_v35, %v635_v34  ;;  %1555 = vmatprep.subr.bf16.mxu0 %v1554_v23  ;;  %v650_v41 = vld [vmem:[#allocation7 + $0x150] sm:$0xff]  ;;  %v640_v42 = vld [vmem:[#allocation7 + $0x100] sm:$0xff]  ;;  %v657_v43 = vld [vmem:[#allocation7 + $0x188] sm:$0xff]  ;;  %v2290_v22 = vand.u32 15, %v399_v5  ;;  %vm442_vm7 = vcmp.ge.s32.totalorder %v2271_v10, 0  ;;  %vm590_vm8 = vcmp.lt.s32.totalorder %v2255_v31, 5 }
  0x94   : > { %v1588_v44 = vpack.c.bf16 %v640_v42, %v634_v39  ;;  %v663_v45 = vld [vmem:[#allocation7 + $0x1b8] sm:$0xff]  ;;  %v653_v47 = vld [vmem:[#allocation7 + $0x168] sm:$0xff]  ;;  %v646_v50 = vld [vmem:[#allocation7 + $0x130] sm:$0xff]  ;;  %v1560_v52 = vpack.c.bf16 %v650_v41, %v644_v38 }
  0x95   : > { %1585 = vmatpush1.bf16.msra.mxu1 %v1584_v32  ;;  %v647_v46 = vld [vmem:[#allocation7 + $0x138] sm:$0xff]  ;;  %v652_v51 = vld [vmem:[#allocation7 + $0x160] sm:$0xff]  ;;  %v662_v54 = vld [vmem:[#allocation7 + $0x1b0] sm:$0xff]  ;;  %v1562_v56 = vpack.c.bf16 %v663_v45, %v657_v43 }
  0x96   : > { %1587 = vmatprep.subr.bf16.mxu1 %v1586_v37  ;;  %v1590_v49 = vpack.c.bf16 %v653_v47, %v647_v46  ;;  %1557 = vmatpush1.bf16.msra.mxu0 %v1556_v36  ;;  %v656_v53 = vld [vmem:[#allocation7 + $0x180] sm:$0xff]  ;;  %v659_v55 = vld [vmem:[#allocation7 + $0x198] sm:$0xff]  ;;  %v669_v57 = vld [vmem:[#allocation7 + $0x1e8] sm:$0xff]  ;;  %v1592_v60 = vpack.c.bf16 %v652_v51, %v646_v50 }
  0x97   : > { %1559 = vmatprep.subr.bf16.mxu0 %v1558_v40  ;;  %v675_v58 = vld [vmem:[#allocation7 + $0x218] sm:$0xff]  ;;  %v665_v59 = vld [vmem:[#allocation7 + $0x1c8] sm:$0xff]  ;;  %v2258_v61 = vld [vmem:[#allocation7 + $0x1e0] sm:$0xff]  ;;  %v1564_v11 = vpack.c.bf16 %v662_v54, %v656_v53 }
  0x98   : > { %v2260_v62 = vld [vmem:[#allocation7 + $0x210] sm:$0xff]  ;;  %v664_v1 = vld [vmem:[#allocation7 + $0x1c0] sm:$0xff]  ;;  %v2262_v2 = vld [vmem:[#allocation7 + $0x248] sm:$0xff]  ;;  %v1594_v6 = vpack.c.bf16 %v665_v59, %v659_v55  ;;  %v1566_v15 = vpack.c.bf16 %v675_v58, %v669_v57 }
  0x99   : > { %1589 = vmatpush1.bf16.msra.mxu1 %v1588_v44  ;;  %v658_v63 = vld [vmem:[#allocation7 + $0x190] sm:$0xff]  ;;  %v2269_v7 = vld [vmem:[#allocation7 + $0x278] sm:$0xff]  ;;  %v677_v9 = vld [vmem:[#allocation7 + $0x228] sm:$0xff]  ;;  %v1568_v23 = vpack.c.bf16 %v2260_v62, %v2258_v61 }
  0x9a   : > { %1591 = vmatprep.subr.bf16.mxu1 %v1590_v49  ;;  %v671_v8 = vld [vmem:[#allocation7 + $0x1f8] sm:$0xff]  ;;  %1561 = vmatpush1.bf16.msra.mxu0 %v1560_v52  ;;  %v2273_v12 = vld [vmem:[#allocation7 + $0x240] sm:$0xff]  ;;  %v2275_v13 = vld [vmem:[#allocation7 + $0x270] sm:$0xff]  ;;  %v1596_v19 = vpack.c.bf16 %v664_v1, %v658_v63  ;;  %v1570_v24 = vpack.c.bf16 %v2269_v7, %v2262_v2 }
  0x9b   : > { %v2277_v14 = vld [vmem:[#allocation7 + $0x1f0] sm:$0xff]  ;;  %1563 = vmatprep.subr.bf16.mxu0 %v1562_v56  ;;  %v676_v16 = vld [vmem:[#allocation7 + $0x220] sm:$0xff]  ;;  %v2281_v17 = vld [vmem:[#allocation7 + $0x2a8] sm:$0xff]  ;;  %v1598_v25 = vpack.c.bf16 %v677_v9, %v671_v8  ;;  %v1572_v28 = vpack.c.bf16 %v2275_v13, %v2273_v12 }
  0x9c   : > { %v2283_v18 = vld [vmem:[#allocation7 + $0x2d8] sm:$0xff]  ;;  %v689_v21 = vld [vmem:[#allocation7 + $0x288] sm:$0xff]  ;;  %v2296_v26 = vld [vmem:[#allocation7 + $0x250] sm:$0xff]  ;;  %v1600_v29 = vpack.c.bf16 %v676_v16, %v2277_v14 }
  0x9d   : > { %1593 = vmatpush1.bf16.msra.mxu1 %v1592_v60  ;;  %v683_v20 = vld [vmem:[#allocation7 + $0x258] sm:$0xff]  ;;  %v2298_v27 = vld [vmem:[#allocation7 + $0x280] sm:$0xff]  ;;  %v1574_v30 = vpack.c.bf16 %v2283_v18, %v2281_v17  ;;  %v698_v57 = vld [vmem:[#allocation7 + $0x2d0] sm:$0xff] }
  0x9e   : > { %1595 = vmatprep.subr.bf16.mxu1 %v1594_v6  ;;  %1565 = vmatpush1.bf16.msra.mxu0 %v1564_v11  ;;  %v1602_v32 = vpack.c.bf16 %v689_v21, %v683_v20  ;;  %v2308_v33 = vld [vmem:[%s2239_s27] sm:$0xff]  ;;  %v2311_v34 = vld [vmem:[%s2239_s27 + $0x8] sm:$0xff]  ;;  %v1604_v36 = vpack.c.bf16 %v2298_v27, %v2296_v26  ;;  %v2374_v20 = vadd.s32 1, %v2290_v22  ;;  %s392_s27 = scalar_lea.vmem [#allocation10], %s1426_s14 }
  0x9f   : > { %v1431_v35 = vld [vmem:[#allocation5 + $0x3] ss:$0 sm:$0xff]  ;;  %1567 = vmatprep.subr.bf16.mxu0 %v1566_v15  ;;  %v1432_v38 = vld [vmem:[%s2560_s2] ss:$0 sm:$0xff]  ;;  %v488_v39 = vrot.slane %v2308_v33, 5  ;;  %v489_v40 = vrot.slane %v2311_v34, 5 }
  0xa0   : > { %v477_v37 = vmul.f32 %v1431_v35, %v2308_v33  ;;  %v2321_v41 = vld [vmem:[#allocation5] ss:$0 sm:$0xff]  ;;  %v508_v42 = vrot.slane %v2308_v33, 6  ;;  %v509_v43 = vrot.slane %v2311_v34, 6  ;;  %v528_v44 = vrot.slane %v2308_v33, 7  ;;  %v692_v52 = vld [vmem:[#allocation7 + $0x2a0] sm:$0xff] }
  0xa1   : > { %1597 = vmatpush1.bf16.msra.mxu1 %v1596_v19  ;;  %v529_v45 = vrot.slane %v2311_v34, 7  ;;  %v492_v47 = vsel %vm490_vm0, %v489_v40, %v488_v39  ;;  %v2333_v48 = vld [vmem:[#allocation5 + $0x1] ss:$0 sm:$0xff]  ;;  %v2335_v49 = vld [vmem:[#allocation5 + $0x2] ss:$0 sm:$0xff]  ;;  %v548_v50 = vrot.slane %v2308_v33, 1  ;;  %v478_v63 = vmul.f32 %v1431_v35, %v2311_v34 }
  0xa2   : > { %1599 = vmatprep.subr.bf16.mxu1 %v1598_v25  ;;  %v486_v46 = vadd.f32 %v1432_v38, %v477_v37  ;;  %v549_v51 = vrot.slane %v2311_v34, 1  ;;  %1569 = vmatpush1.bf16.msra.mxu0 %v1568_v23  ;;  %v497_v53 = vsel %vm426_vm5, %v492_v47, 0.0  ;;  %v512_v54 = vsel %vm510_vm1, %v509_v43, %v508_v42  ;;  %v695_v61 = vld [vmem:[#allocation7 + $0x2b8] sm:$0xff]  ;;  %v701_v62 = vld [vmem:[#allocation7 + $0x2e8] sm:$0xff]  ;;  %v694_v15 = vld [vmem:[#allocation7 + $0x2b0] sm:$0xff]  ;;  %s1314_s15 = sshll.u32 %s392_s27, 4  ;;  %s2514_s15 = int_to_ptr.vmem [resolvable:$true] %s1314_s15 }
  0xa3   : > { %v532_v55 = vsel %vm530_vm2, %v529_v45, %v528_v44  ;;  %v568_v56 = vrot.slane %v2308_v33, 2  ;;  %1571 = vmatprep.subr.bf16.mxu0 %v1570_v24  ;;  %v504_v58 = vmul.f32 %v2321_v41, %v497_v53  ;;  %v517_v59 = vsel %vm434_vm6, %v512_v54, 0.0  ;;  %v1436_v6 = vld [vmem:[#allocation5 + $0x4] ss:$0 sm:$0xff]  ;;  %v613_v8 = vld [vmem:[#allocation7 + $0x28] sm:$0xff]  ;;  %v700_v16 = vld [vmem:[#allocation7 + $0x2e0] sm:$0xff]  ;;  %p1911_p3 = scmp.lt.s32.totalorder %s2514_s15, %s1909_s28 }
  0xa4   : > { %v537_v60 = vsel %vm442_vm7, %v532_v55, 0.0  ;;  %v524_v1 = vmul.f32 %v2333_v48, %v517_v59  ;;  %v551_v5 = vsel %vm550_vm3, %v548_v50, %v549_v51  ;;  %v569_v7 = vrot.slane %v2311_v34, 2  ;;  %v619_v9 = vld [vmem:[#allocation7 + $0x58] sm:$0xff]  ;;  %s1904_s14 = scalar_lea.vmem %s2514_s15, 256 }
  0xa5   : > { %1601 = vmatpush1.bf16.msra.mxu1 %v1600_v29  ;;  %v544_v2 = vmul.f32 %v2335_v49, %v537_v60  ;;  %v506_v11 = vadd.f32 %v504_v58, %v486_v46  ;;  %v588_v12 = vrot.slane %v2308_v33, 3  ;;  %v589_v13 = vrot.slane %v2311_v34, 3  ;;  %v1437_v19 = vld [vmem:[#allocation5 + $0x5] ss:$0 sm:$0xff]  ;;  %v1438_v26 = vld [vmem:[#allocation5 + $0x6] ss:$0 sm:$0xff]  ;;  %p1905_p1 = scmp.ne.s32.totalorder %s2514_s15, %s1904_s14  ;;  %p1912_p7 = scmp.lt.s32.totalorder %s1910_s20, %s1904_s14 }
  0xa6   : > { %1603 = vmatprep.subr.bf16.mxu1 %v1602_v32  ;;  %v1606_v14 = vpack.c.bf16 %v701_v62, %v695_v61  ;;  %1573 = vmatpush1.bf16.msra.mxu0 %v1572_v28  ;;  %v1576_v17 = vpack.c.bf16 %v698_v57, %v692_v52  ;;  %v571_v18 = vsel %vm570_vm4, %v568_v56, %v569_v7  ;;  %v2379_v28 = vadd.s32 2, %v2290_v22  ;;  %v631_v53 = vld [vmem:[#allocation7 + $0xb8] sm:$0xff]  ;;  %v624_v60 = vld [vmem:[#allocation7 + $0x80] sm:$0xff]  ;;  %v630_v61 = vld [vmem:[#allocation7 + $0xb0] sm:$0xff] }
  0xa7   : > { %1575 = vmatprep.subr.bf16.mxu0 %v1574_v30  ;;  %v526_v21 = vadd.f32 %v524_v1, %v506_v11  ;;  %v564_v23 = vmul.f32 %v1436_v6, %v551_v5  ;;  %v1610_v24 = vpack.c.bf16 %v619_v9, %v613_v8  ;;  %v591_v25 = vsel %vm590_vm8, %v588_v12, %v589_v13  ;;  %v637_v62 = vld [vmem:[#allocation7 + $0xe8] sm:$0xff]  ;;  %v636_v9 = vld [vmem:[#allocation7 + $0xe0] sm:$0xff]  ;;  %v642_v11 = vld [vmem:[#allocation7 + $0x110] sm:$0xff]  ;;  %p1906_p4 = pnand %p1905_p1, %p2182_p6  ;;  %p1913_p9 = por %p1912_p7, %p1911_p3 }
  0xa8   : > { %v1608_v27 = vpack.c.bf16 %v700_v16, %v694_v15  ;;  %v487_v29 = vadd.f32 %v1432_v38, %v478_v63  ;;  %v584_v35 = vmul.f32 %v1437_v19, %v571_v18  ;;  %v2382_v37 = vadd.s32 3, %v2290_v22  ;;  %v643_v63 = vld [vmem:[#allocation7 + $0x118] sm:$0xff]  ;;  %v648_v18 = vld [vmem:[#allocation7 + $0x140] sm:$0xff] }
  0xa9   : > { %1605 = vmatpush1.bf16.msra.mxu1 %v1604_v36  ;;  %v546_v32 = vadd.f32 %v544_v2, %v526_v21  ;;  %v491_v30 = vsel %vm490_vm0, %v488_v39, %v489_v40  ;;  %vm453_vm9 = vcmp.lt.s32.totalorder %v2374_v20, 16  ;;  %v511_v22 = vsel %vm510_vm1, %v508_v42, %v509_v43  ;;  %v612_v39 = vld [vmem:[#allocation7 + $0x20] sm:$0xff]  ;;  %v618_v40 = vld [vmem:[#allocation7 + $0x50] sm:$0xff]  ;;  %v661_v21 = vld [vmem:[#allocation7 + $0x1a8] sm:$0xff]  ;;  %p1907_p8 = pneg %p1906_p4 }
  0xaa   : > { %1607 = vmatprep.subr.bf16.mxu1 %v1606_v14  ;;  %1577 = vmatpush1.bf16.msra.mxu0 %v1576_v17  ;;  %v505_v36 = vmul.f32 %v2321_v41, %v491_v30  ;;  %v531_v38 = vsel %vm530_vm2, %v528_v44, %v529_v45  ;;  %v604_v47 = vmul.f32 %v1438_v26, %v591_v25  ;;  %v625_v41 = vld [vmem:[#allocation7 + $0x88] sm:$0xff]  ;;  %vm461_vm10 = vcmp.lt.s32.totalorder %v2379_v28, 16 }
  0xab   : > { %v566_v46 = vadd.f32 %v564_v23, %v546_v32  ;;  %1611 = vmatprep.subr.bf16.mxu0 %v1610_v24  ;;  %v525_v52 = vmul.f32 %v2333_v48, %v511_v22  ;;  %v545_v42 = vmul.f32 %v2335_v49, %v531_v38  ;;  %v552_v43 = vsel %vm550_vm3, %v549_v51, %v548_v50  ;;  %v667_v23 = vld [vmem:[#allocation7 + $0x1d8] sm:$0xff]  ;;  %v678_v22 = vld [vmem:[#allocation7 + $0x230] sm:$0xff]  ;;  %v685_v38 = vld [vmem:[#allocation7 + $0x268] sm:$0xff]  ;;  %p1914_p12 = pnand %p1913_p9, %p1907_p8 }
  0xac   : > { %v507_v54 = vadd.f32 %v505_v36, %v487_v29  ;;  %vm469_vm11 = vcmp.lt.s32.totalorder %v2382_v37, 16  ;;  %v558_v45 = vsel %vm453_vm9, %v552_v43, 0.0  ;;  %v1612_v48 = vpack.c.bf16 %v618_v40, %v612_v39  ;;  %v673_v29 = vld [vmem:[#allocation7 + $0x208] sm:$0xff]  ;;  %v679_v32 = vld [vmem:[#allocation7 + $0x238] sm:$0xff]  ;;  %v672_v36 = vld [vmem:[#allocation7 + $0x200] sm:$0xff] }
  0xad   : > { %1609 = vmatpush1.bf16.msra.mxu1 %v1608_v27  ;;  %v586_v44 = vadd.f32 %v584_v35, %v566_v46  ;;  %v565_v57 = vmul.f32 %v1436_v6, %v558_v45  ;;  %v572_v49 = vsel %vm570_vm4, %v569_v7, %v568_v56  ;;  %v1614_v59 = vpack.c.bf16 %v631_v53, %v625_v41  ;;  %v666_v27 = vld [vmem:[#allocation7 + $0x1d0] sm:$0xff]  ;;  %v691_v46 = vld [vmem:[#allocation7 + $0x298] sm:$0xff]  ;;  %v684_v40 = vld [vmem:[#allocation7 + $0x260] sm:$0xff] }
  0xae   : > { %v527_v55 = vadd.f32 %v525_v52, %v507_v54  ;;  %v578_v50 = vsel %vm461_vm10, %v572_v49, 0.0  ;;  %v592_v51 = vsel %vm590_vm8, %v589_v13, %v588_v12  ;;  %v1616_v56 = vpack.c.bf16 %v630_v61, %v624_v60  ;;  %v649_v12 = vld [vmem:[#allocation7 + $0x148] sm:$0xff]  ;;  %v655_v13 = vld [vmem:[#allocation7 + $0x178] sm:$0xff]  ;;  %v690_v52 = vld [vmem:[#allocation7 + $0x290] sm:$0xff] }
  0xaf   : > { %v2418_v58 = vadd.f32 %v604_v47, %v586_v44  ;;  %v585_v2 = vmul.f32 %v1437_v19, %v578_v50  ;;  %v598_v5 = vsel %vm469_vm11, %v592_v51, 0.0  ;;  %v1618_v8 = vpack.c.bf16 %v643_v63, %v637_v62  ;;  %v654_v19 = vld [vmem:[#allocation7 + $0x170] sm:$0xff]  ;;  %v697_v41 = vld [vmem:[#allocation7 + $0x2c8] sm:$0xff]  ;;  %v703_v53 = vld [vmem:[#allocation7 + $0x2f8] sm:$0xff] }
  0xb0   : > { %v547_v1 = vadd.f32 %v545_v42, %v527_v55  ;;  %v605_v7 = vmul.f32 %v1438_v26, %v598_v5  ;;  %v1620_v15 = vpack.c.bf16 %v642_v11, %v636_v9  ;;  %v1622_v17 = vpack.c.bf16 %v655_v13, %v649_v12  ;;  %v660_v26 = vld [vmem:[#allocation7 + $0x1a0] sm:$0xff]  ;;  %v702_v44 = vld [vmem:[#allocation7 + $0x2f0] sm:$0xff]  ;;  %v1002_v55 = vld [vmem:[#allocation8 + $0x88] sm:$0xff] }
  0xb1   : > { %801 = vmatmul.mubr.f32.vlgmr.msra.gmra.mrb[0].mxu0 %v2418_v58  ;;  %878 = vmatmul.mubr.f32.vlgmr.msra.gmra.mrb[0].mxu1 %v2418_v58  ;;  %v1624_v24 = vpack.c.bf16 %v654_v19, %v648_v18  ;;  %v1626_v25 = vpack.c.bf16 %v667_v23, %v661_v21  ;;  %v1628_v35 = vpack.c.bf16 %v666_v27, %v660_v26  ;;  %v696_v43 = vld [vmem:[#allocation7 + $0x2c0] sm:$0xff]  ;;  %v1003_v61 = vld [vmem:[#allocation8 + $0x90] sm:$0xff]  ;;  %v1004_v50 = vld [vmem:[#allocation8 + $0x98] sm:$0xff] }
  0xb2   : > { %1613 = vmatpush1.bf16.msra.mxu0 %v1612_v48  ;;  %806 = vmatprep.mubr.f32.mxu0 %v1988_v0  ;;  %v567_v6 = vadd.f32 %v565_v57, %v547_v1  ;;  %v1630_v30 = vpack.c.bf16 %v679_v32, %v673_v29  ;;  %v1632_v47 = vpack.c.bf16 %v678_v22, %v672_v36  ;;  %v1001_v48 = vld [vmem:[#allocation8 + $0x80] sm:$0xff]  ;;  %v1018_v63 = vld [vmem:[#allocation8 + $0x108] sm:$0xff]  ;;  %v987_v1 = vld [vmem:[#allocation8 + $0x10] sm:$0xff] }
  0xb3   : > { %1615 = vmatprep.subr.bf16.mxu0 %v1614_v59  ;;  %883 = vmatprep.mubr.f32.mxu1 %v1988_v0  ;;  %v1634_v39 = vpack.c.bf16 %v691_v46, %v685_v38  ;;  %v1636_v54 = vpack.c.bf16 %v690_v52, %v684_v40  ;;  %v1638_v42 = vpack.c.bf16 %v703_v53, %v697_v41  ;;  %v985_v49 = vld [vmem:[#allocation8] sm:$0xff]  ;;  %v986_v59 = vld [vmem:[#allocation8 + $0x8] sm:$0xff]  ;;  %v991_v19 = vld [vmem:[#allocation8 + $0x30] sm:$0xff] }
  0xb4   : > { %v587_v14 = vadd.f32 %v585_v2, %v567_v6  ;;  %v1640_v45 = vpack.c.bf16 %v702_v44, %v696_v43  ;;  %v1642_v57 = vpack.c.bf16 %v1002_v55, %v1001_v48  ;;  %v1644_v60 = vpack.c.bf16 %v986_v59, %v985_v49  ;;  %v1017_v51 = vld [vmem:[#allocation8 + $0x100] sm:$0xff]  ;;  %v988_v2 = vld [vmem:[#allocation8 + $0x18] sm:$0xff]  ;;  %v1019_v6 = vld [vmem:[#allocation8 + $0x110] sm:$0xff] }
  0xb5   : > { %v1646_v62 = vpack.c.bf16 %v1004_v50, %v1003_v61  ;;  %v1674_v5 = vpack.c.bf16 %v1018_v63, %v1017_v51  ;;  %v989_v9 = vld [vmem:[#allocation8 + $0x20] sm:$0xff]  ;;  %v990_v11 = vld [vmem:[#allocation8 + $0x28] sm:$0xff]  ;;  %v992_v21 = vld [vmem:[#allocation8 + $0x38] sm:$0xff] }
  0xb6   : > { %1617 = vmatpush1.bf16.msra.mxu0 %v1616_v56  ;;  %v607_v16 = vadd.f32 %v605_v7, %v587_v14  ;;  %1643 = vmatprep.subr.bf16.mxu1 %v1642_v57  ;;  %v1005_v56 = vld [vmem:[#allocation8 + $0xa0] sm:$0xff]  ;;  %v1652_v13 = vpack.c.bf16 %v990_v11, %v989_v9  ;;  %v1007_v14 = vld [vmem:[#allocation8 + $0xb0] sm:$0xff]  ;;  %v1022_v18 = vld [vmem:[#allocation8 + $0x128] sm:$0xff]  ;;  %v1656_v29 = vpack.c.bf16 %v992_v21, %v991_v19 }
  0xb7   : > { %1619 = vmatprep.subr.bf16.mxu0 %v1618_v8  ;;  %1645 = vmatpush3.bf16.msra.mxu1 %v1644_v60  ;;  %v1020_v8 = vld [vmem:[#allocation8 + $0x118] sm:$0xff]  ;;  %v1023_v26 = vld [vmem:[#allocation8 + $0x130] sm:$0xff]  ;;  %v1025_v46 = vld [vmem:[#allocation8 + $0x140] sm:$0xff] }
  0xb8   : > { %807 = vmatmul.mubr.f32.gmra.mrb[2].mxu0 %v607_v16  ;;  %884 = vmatmul.mubr.f32.gmra.mrb[2].mxu1 %v607_v16  ;;  %v1678_v12 = vpack.c.bf16 %v1020_v8, %v1019_v6  ;;  %v1024_v27 = vld [vmem:[#allocation8 + $0x138] sm:$0xff]  ;;  %v1011_v22 = vld [vmem:[#allocation8 + $0xd0] sm:$0xff]  ;;  %v997_v55 = vld [vmem:[#allocation8 + $0x60] sm:$0xff]  ;;  %v708_v6 = vsub.s32 0, %v2255_v31  ;;  %v720_v8 = vsub.s32 3, %v2255_v31 }
  0xb9   : > { %954 = vmatprep.mubr.f32.mxu0 %v1988_v0  ;;  %1647 = vmatprep.subr.bf16.mxu1 %v1646_v62  ;;  %v1686_v36 = vpack.c.bf16 %v1024_v27, %v1023_v26  ;;  %v1012_v38 = vld [vmem:[#allocation8 + $0xd8] sm:$0xff]  ;;  %v995_v52 = vld [vmem:[#allocation8 + $0x50] sm:$0xff]  ;;  %v998_v57 = vld [vmem:[#allocation8 + $0x68] sm:$0xff] }
  0xba   : > { %1621 = vmatpush1.bf16.msra.mxu0 %v1620_v15  ;;  %v1008_v15 = vld [vmem:[#allocation8 + $0xb8] sm:$0xff]  ;;  %v1662_v40 = vpack.c.bf16 %v1012_v38, %v1011_v22  ;;  %v1027_v43 = vld [vmem:[#allocation8 + $0x150] sm:$0xff]  ;;  %v1668_v59 = vpack.c.bf16 %v998_v57, %v997_v55  ;;  %v1029_v50 = vld [vmem:[#allocation8 + $0x160] sm:$0xff]  ;;  %v712_v22 = vsub.s32 1, %v2255_v31 }
  0xbb   : > { %1623 = vmatprep.subr.bf16.mxu0 %v1622_v17  ;;  %v1654_v17 = vpack.c.bf16 %v1008_v15, %v1007_v14  ;;  %v996_v41 = vld [vmem:[#allocation8 + $0x58] sm:$0xff]  ;;  %v1015_v60 = vld [vmem:[#allocation8 + $0xf0] sm:$0xff]  ;;  %v1030_v62 = vld [vmem:[#allocation8 + $0x168] sm:$0xff] }
  0xbc   : > { %v1028_v44 = vld [vmem:[#allocation8 + $0x158] sm:$0xff]  ;;  %v999_v63 = vld [vmem:[#allocation8 + $0x70] sm:$0xff] }
  0xbd   : > { %v1694_v49 = vpack.c.bf16 %v1028_v44, %v1027_v43  ;;  %v1016_v61 = vld [vmem:[#allocation8 + $0xf8] sm:$0xff] }
  0xbe   : > { %1625 = vmatpush1.bf16.msra.mxu0 %v1624_v24  ;;  %v1009_v24 = vld [vmem:[#allocation8 + $0xc0] sm:$0xff]  ;;  %v1670_v51 = vpack.c.bf16 %v1016_v61, %v1015_v60 }
  0xbf   : > { %1627 = vmatprep.subr.bf16.mxu0 %v1626_v25  ;;  %v1010_v25 = vld [vmem:[#allocation8 + $0xc8] sm:$0xff] }
  0xc0   : > { %v1658_v32 = vpack.c.bf16 %v1010_v25, %v1009_v24 }
  0xc2   : > { %1629 = vmatpush1.bf16.msra.mxu0 %v1628_v35  ;;  %v993_v35 = vld [vmem:[#allocation8 + $0x40] sm:$0xff] }
  0xc3   : > { %1631 = vmatprep.subr.bf16.mxu0 %v1630_v30  ;;  %v994_v30 = vld [vmem:[#allocation8 + $0x48] sm:$0xff] }
  0xc6   : > { %1633 = vmatpush1.bf16.msra.mxu0 %v1632_v47  ;;  %v1026_v47 = vld [vmem:[#allocation8 + $0x148] sm:$0xff] }
  0xc7   : > { %1635 = vmatprep.subr.bf16.mxu0 %v1634_v39  ;;  %v1660_v39 = vpack.c.bf16 %v994_v30, %v993_v35  ;;  %v1690_v53 = vpack.c.bf16 %v1026_v47, %v1025_v46 }
  0xca   : > { %1637 = vmatpush1.bf16.msra.mxu0 %v1636_v54  ;;  %v1013_v54 = vld [vmem:[#allocation8 + $0xe0] sm:$0xff] }
  0xcb   : > { %1639 = vmatprep.subr.bf16.mxu0 %v1638_v42  ;;  %v1014_v42 = vld [vmem:[#allocation8 + $0xe8] sm:$0xff] }
  0xcc   : > { %v1666_v48 = vpack.c.bf16 %v1014_v42, %v1013_v54 }
  0xce   : > { %1641 = vmatpush1.bf16.msra.mxu0 %v1640_v45  ;;  %v1664_v45 = vpack.c.bf16 %v996_v41, %v995_v52  ;;  %v728_v52 = vsub.s32 5, %v2255_v31 }
  0xcf   : > { %1675 = vmatprep.subr.bf16.mxu0 %v1674_v5 }
  0xd1   : > { %955 = vmatmul.mubr.f32.vlgmr.msra.gmra.mrb[4].mxu0 %v2418_v58  ;;  %v1648_v58 = vpack.c.bf16 %v988_v2, %v987_v1  ;;  %v1000_v1 = vld [vmem:[#allocation8 + $0x78] sm:$0xff]  ;;  %v1698_v2 = vpack.c.bf16 %v1030_v62, %v1029_v50 }
  0xd2   : > { %960 = vmatprep.mubr.f32.mxu0 %v1988_v0  ;;  %v1006_v0 = vld [vmem:[#allocation8 + $0xa8] sm:$0xff]  ;;  %1677 = vmatpush3.bf16.msra.mxu0 %v1674_v5  ;;  %v1672_v5 = vpack.c.bf16 %v1000_v1, %v999_v63 }
  0xd3   : > { %v1650_v7 = vpack.c.bf16 %v1006_v0, %v1005_v56  ;;  %1649 = vmatpush3.bf16.msra.mxu1 %v1648_v58  ;;  %1679 = vmatprep.subr.bf16.mxu0 %v1678_v12  ;;  %v1031_v58 = vld [vmem:[#allocation8 + $0x170] sm:$0xff]  ;;  %v1032_v56 = vld [vmem:[#allocation8 + $0x178] sm:$0xff] }
  0xd4   : > { %v1702_v0 = vpack.c.bf16 %v1032_v56, %v1031_v58 }
  0xd5   : > { %961 = vmatmul.mubr.f32.gmra.mrb[6].mxu0 %v607_v16  ;;  %v1021_v16 = vld [vmem:[#allocation8 + $0x120] sm:$0xff]  ;;  %1651 = vmatprep.subr.bf16.mxu1 %v1650_v7  ;;  %v704_v7 = vld [vmem:[%s2562_s4] sm:$0x3f] }
  0xd6   : > { %v1682_v23 = vpack.c.bf16 %v1022_v18, %v1021_v16  ;;  %1681 = vmatpush3.bf16.msra.mxu0 %v1678_v12  ;;  %v709_v9 = vrot.slane %v704_v7, %v708_v6  ;;  %v721_v11 = vrot.slane %v704_v7, %v720_v8  ;;  %v713_v46 = vrot.slane %v704_v7, %v712_v22  ;;  %v1439_v8 = vld [vmem:[%s2564_s6] ss:$0 sm:$0xff] }
  0xd7   : > { %1653 = vmatpush3.bf16.msra.mxu1 %v1652_v13  ;;  %v729_v44 = vrot.slane %v704_v7, %v728_v52  ;;  %v1442_v22 = vld [vmem:[%s2565_s7] ss:$0 sm:$0xff]  ;;  %v1443_v52 = vld [vmem:[%s2565_s7 + $0x1] ss:$0 sm:$0xff] }
  0xd8   : > { %1655 = vmatprep.subr.bf16.mxu1 %v1654_v17  ;;  %1683 = vmatprep.subr.bf16.mxu0 %v1682_v23 }
  0xda   : > { %1685 = vmatpush3.bf16.msra.mxu0 %v1682_v23 }
  0xdb   : > { %1657 = vmatpush3.bf16.msra.mxu1 %v1656_v29  ;;  %1687 = vmatprep.subr.bf16.mxu0 %v1686_v36 }
  0xdc   : > { %1659 = vmatprep.subr.bf16.mxu1 %v1658_v32 }
  0xde   : > { %1689 = vmatpush3.bf16.msra.mxu0 %v1686_v36  ;;  %v716_v36 = vsub.s32 2, %v2255_v31 }
  0xdf   : > { %1661 = vmatpush3.bf16.msra.mxu1 %v1660_v39  ;;  %1691 = vmatprep.subr.bf16.mxu0 %v1690_v53 }
  0xe0   : > { %1663 = vmatprep.subr.bf16.mxu1 %v1662_v40  ;;  %v717_v38 = vrot.slane %v704_v7, %v716_v36  ;;  %v724_v40 = vsub.s32 4, %v2255_v31 }
  0xe2   : > { %1693 = vmatpush3.bf16.msra.mxu0 %v1690_v53  ;;  %v725_v43 = vrot.slane %v704_v7, %v724_v40 }
  0xe3   : > { %1665 = vmatpush3.bf16.msra.mxu1 %v1664_v45  ;;  %1695 = vmatprep.subr.bf16.mxu0 %v1694_v49 }
  0xe4   : > { %1667 = vmatprep.subr.bf16.mxu1 %v1666_v48 }
  0xe6   : > { %1697 = vmatpush3.bf16.msra.mxu0 %v1694_v49 }
  0xe7   : > { %1669 = vmatpush3.bf16.msra.mxu1 %v1668_v59  ;;  %1699 = vmatprep.subr.bf16.mxu0 %v1698_v2 }
  0xe8   : > { %1671 = vmatprep.subr.bf16.mxu1 %v1670_v51 }
  0xea   : > { %1701 = vmatpush3.bf16.msra.mxu0 %v1698_v2 }
  0xeb   : > { %1673 = vmatpush3.bf16.msra.mxu1 %v1672_v5  ;;  %1703 = vmatprep.subr.bf16.mxu0 %v1702_v0 }
  0xee   : > { %1705 = vmatpush3.bf16.msra.mxu0 %v1702_v0 }
 0x184   : > { %v802_v12 = vpop.f32.mrb[0].mxu0  ;;  %v879_v13 = vpop.f32.mrb[0].mxu1 }
 0x185   : > { %v803_v14 = vadd.f32 %v802_v12, %v709_v9  ;;  %v804_v15 = vpop.f32.mrb[1].mxu0  ;;  %v881_v16 = vpop.f32.mrb[1].mxu1  ;;  %v880_v47 = vadd.f32 %v879_v13, %v717_v38 }
 0x186   : > { %v882_v18 = vadd.f32 %v881_v16, %v721_v11  ;;  %v805_v39 = vadd.f32 %v804_v15, %v713_v46 }
 0x187   : > { %v967_v17 = vmax.f32 %v803_v14, 0.0  ;;  %v969_v41 = vmax.f32 %v880_v47, 0.0 }
 0x188   : > { %v968_v54 = vmax.f32 %v805_v39, 0.0 }
 0x189   : > { %v973_v19 = vmin.f32 %v967_v17, 6.0  ;;  %v975_v45 = vmin.f32 %v969_v41, 6.0 }
 0x18a   : > { %v974_v57 = vmin.f32 %v968_v54, 6.0 }
 0x18b   : > { %v979_v21 = vmul.f32 %v973_v19, %v882_v18  ;;  %v808_v23 = vpop.f32.mrb[2].mxu0  ;;  %v885_v24 = vpop.f32.mrb[2].mxu1  ;;  %v1440_v18 = vld [vmem:[%s2565_s7 + $0x3] ss:$0 sm:$0xff] }
 0x18c   : > { %v809_v25 = vadd.f32 %v808_v23, %v709_v9  ;;  %v810_v26 = vpop.f32.mrb[3].mxu0  ;;  %v887_v27 = vpop.f32.mrb[3].mxu1  ;;  %v886_v53 = vadd.f32 %v885_v24, %v717_v38  ;;  %v1441_v24 = vld [vmem:[%s2566_s8] ss:$0 sm:$0xff] }
 0x18d   : > { %v888_v32 = vadd.f32 %v887_v27, %v721_v11  ;;  %v811_v42 = vadd.f32 %v810_v26, %v713_v46 }
 0x18e   : > { %v970_v29 = vmax.f32 %v809_v25, 0.0  ;;  %v972_v48 = vmax.f32 %v886_v53, 0.0 }
 0x18f   : > { %v971_v49 = vmax.f32 %v811_v42, 0.0 }
 0x190   : > { %v976_v35 = vmin.f32 %v970_v29, 6.0  ;;  %v978_v51 = vmin.f32 %v972_v48, 6.0 }
 0x191   : > { %v977_v1 = vmin.f32 %v971_v49, 6.0 }
 0x192   : > { %v982_v30 = vmul.f32 %v976_v35, %v888_v32 }
 0x1a4   : > { %v956_v55 = vpop.f32.mrb[4].mxu0 }
 0x1a5   : > { %v957_v59 = vadd.f32 %v956_v55, %v725_v43  ;;  %v958_v60 = vpop.f32.mrb[5].mxu0 }
 0x1a6   : > { %v959_v61 = vadd.f32 %v958_v60, %v729_v44  ;;  %v1444_v60 = vld [vmem:[%s2565_s7 + $0x2] ss:$0 sm:$0xff] }
 0x1a7   : > { %v980_v50 = vmul.f32 %v974_v57, %v957_v59 }
 0x1a8   : > { %v981_v62 = vmul.f32 %v975_v45, %v959_v61  ;;  %v962_v63 = vpop.f32.mrb[6].mxu0 }
 0x1a9   : > { %v963_v2 = vadd.f32 %v962_v63, %v725_v43  ;;  %v964_v5 = vpop.f32.mrb[7].mxu0  ;;  %1104 = vmatprep.mubr.f32.mxu1 %v980_v50 }
 0x1aa   : > { %v965_v58 = vadd.f32 %v964_v5, %v729_v44  ;;  %1105 = vmatmul.mubr.f32.vlgmr.msra.gmra.mrb[4].mxu1 %v979_v21  ;;  %1543 = vmatprep.mubr.f32.mxu0 %v981_v62 }
 0x1ab   : > { %v983_v56 = vmul.f32 %v977_v1, %v963_v2  ;;  %v1445_v2 = vld [vmem:[%s2565_s7 + $0x4] ss:$0 sm:$0xff] }
 0x1ac   : > { %v984_v0 = vmul.f32 %v978_v51, %v965_v58 }
 0x1ad   : > { %1109 = vmatprep.mubr.f32.mxu1 %v983_v56 }
 0x1ae   : > { %1110 = vmatmul.mubr.f32.gmra.mrb[6].mxu1 %v982_v30  ;;  %1544 = vmatmul.mubr.f32.vlgmr.msra.gmra.mrb[8].mxu0 %v984_v0 }
 0x27d   : > { %v1487_v6 = vpop.f32.mrb[4].mxu1 }
 0x27e   : > { %v1488_v7 = vpop.f32.mrb[5].mxu1 }
 0x27f   : > { %v1489_v9 = vadd.f32 %v1488_v7, %v1487_v6  ;;  %v1446_v7 = vld [vmem:[%s2565_s7 + $0x5] ss:$0 sm:$0xff] }
 0x281   : > { %v1490_v11 = vpop.f32.mrb[6].mxu1  ;;  %v1545_v12 = vpop.f32.mrb[8].mxu0  ;;  %v1107_v13 = vadd.f32 %v1489_v9, %v1439_v8 }
 0x282   : > { %v1491_v14 = vpop.f32.mrb[7].mxu1  ;;  %v1181_v15 = vpop.f32.mrb[9].mxu0 }
 0x283   : > { %v1492_v16 = vadd.f32 %v1491_v14, %v1490_v11  ;;  %v1182_v17 = vadd.f32 %v1181_v15, %v1107_v13 }
 0x285   : > { %v1112_v19 = vadd.f32 %v1492_v16, %v1439_v8  ;;  %v1195_v21 = vmul.f32 %v1440_v18, %v1182_v17  ;;  %v1206_v25 = vrot.slane %v1182_v17, 5  ;;  %v1221_v26 = vrot.slane %v1182_v17, 6  ;;  %v1447_v16 = vld [vmem:[%s2565_s7 + $0x6] ss:$0 sm:$0xff] }
 0x286   : > { %v1236_v27 = vrot.slane %v1182_v17, 7  ;;  %v1251_v29 = vrot.slane %v1182_v17, 1  ;;  %v1266_v32 = vrot.slane %v1182_v17, 2  ;;  %v1281_v38 = vrot.slane %v1182_v17, 3 }
 0x287   : > { %v1187_v23 = vadd.f32 %v1545_v12, %v1112_v19  ;;  %v1204_v40 = vadd.f32 %v1441_v24, %v1195_v21 }
 0x289   : > { %v1207_v35 = vrot.slane %v1187_v23, 5  ;;  %v1222_v30 = vrot.slane %v1187_v23, 6  ;;  %v1237_v36 = vrot.slane %v1187_v23, 7  ;;  %v1252_v46 = vrot.slane %v1187_v23, 1 }
 0x28a   : > { %v1267_v47 = vrot.slane %v1187_v23, 2  ;;  %v1196_v39 = vmul.f32 %v1440_v18, %v1187_v23  ;;  %v1282_v55 = vrot.slane %v1187_v23, 3 }
 0x28b   : > { %v1208_v41 = vsel %vm490_vm0, %v1206_v25, %v1207_v35  ;;  %v1209_v53 = vsel %vm490_vm0, %v1207_v35, %v1206_v25  ;;  %v1223_v54 = vsel %vm510_vm1, %v1221_v26, %v1222_v30  ;;  %v1224_v42 = vsel %vm510_vm1, %v1222_v30, %v1221_v26 }
 0x28c   : > { %v1205_v43 = vadd.f32 %v1441_v24, %v1196_v39  ;;  %v1210_v44 = vsel %vm426_vm5, %v1209_v53, 0.0  ;;  %v1218_v45 = vmul.f32 %v1442_v22, %v1208_v41  ;;  %v1225_v48 = vsel %vm434_vm6, %v1224_v42, 0.0 }
 0x28d   : > { %v1217_v57 = vmul.f32 %v1442_v22, %v1210_v44  ;;  %v1232_v49 = vmul.f32 %v1443_v52, %v1225_v48  ;;  %v1238_v59 = vsel %vm530_vm2, %v1236_v27, %v1237_v36  ;;  %v1233_v50 = vmul.f32 %v1443_v52, %v1223_v54 }
 0x28e   : > { %v1220_v61 = vadd.f32 %v1218_v45, %v1205_v43  ;;  %v1239_v3 = vsel %vm530_vm2, %v1237_v36, %v1236_v27  ;;  %v1254_v51 = vsel %vm550_vm3, %v1252_v46, %v1251_v29  ;;  %v1253_v63 = vsel %vm550_vm3, %v1251_v29, %v1252_v46 }
 0x28f   : > { %v1219_v4 = vadd.f32 %v1217_v57, %v1204_v40  ;;  %v1240_v62 = vsel %vm442_vm7, %v1239_v3, 0.0  ;;  %v1256_v1 = vsel %vm453_vm9, %v1254_v51, 0.0  ;;  %v1248_v56 = vmul.f32 %v1444_v60, %v1238_v59 }
 0x290   : > { %v1235_v5 = vadd.f32 %v1233_v50, %v1220_v61  ;;  %v1247_v58 = vmul.f32 %v1444_v60, %v1240_v62  ;;  %v1268_v6 = vsel %vm570_vm4, %v1266_v32, %v1267_v47  ;;  %v1269_v10 = vsel %vm570_vm4, %v1267_v47, %v1266_v32 }
 0x291   : > { %v1234_v0 = vadd.f32 %v1232_v49, %v1219_v4  ;;  %v1283_v20 = vsel %vm590_vm8, %v1281_v38, %v1282_v55  ;;  %v1263_v9 = vmul.f32 %v1445_v2, %v1256_v1  ;;  %v1271_v11 = vsel %vm461_vm10, %v1269_v10, 0.0 }
 0x292   : > { %v1250_v8 = vadd.f32 %v1248_v56, %v1235_v5  ;;  %v1284_v12 = vsel %vm590_vm8, %v1282_v55, %v1281_v38  ;;  %v1262_v14 = vmul.f32 %v1445_v2, %v1253_v63  ;;  %v1278_v18 = vmul.f32 %v1446_v7, %v1271_v11 }
 0x293   : > { %v1249_v13 = vadd.f32 %v1247_v58, %v1234_v0  ;;  %v1286_v15 = vsel %vm469_vm11, %v1284_v12, 0.0  ;;  %v1277_v21 = vmul.f32 %v1446_v7, %v1268_v6  ;;  %v1292_v31 = vmul.f32 %v1447_v16, %v1283_v20 }
 0x294   : > { %v1265_v17 = vadd.f32 %v1263_v9, %v1250_v8  ;;  %v1293_v23 = vmul.f32 %v1447_v16, %v1286_v15 }
 0x295   : > { %v1264_v19 = vadd.f32 %v1262_v14, %v1249_v13 }
 0x296   : > { %v1280_v28 = vadd.f32 %v1278_v18, %v1265_v17 }
 0x297   : > { %v1279_v24 = vadd.f32 %v1277_v21, %v1264_v19 }
 0x298   : > { %v1295_v37 = vadd.f32 %v1293_v23, %v1280_v28 }
 0x299   : > { %v1294_v25 = vadd.f32 %v1292_v31, %v1279_v24 }
 0x29a   : > { %v1297_v26 = vadd.f32 %v1295_v37, %v2311_v34 }
 0x29b   : > { %v1296_v27 = vadd.f32 %v1294_v25, %v2308_v33 }
 0x29c   : > { %1299 = vst [vmem:[%s392_s27 + $0x8] sm:$0xff] %v1297_v26 }
 0x29d   : > { %1298 = vst [vmem:[%s392_s27] sm:$0xff] %v1296_v27 }
 0x29e   : > { %1917 = shalt.err (!%p1914_p12)
}
 0x29f   : > { %s1918_s24 = scalar_lea.hbm %s2512_s26, 256  ;;  %s1922_s18 = scalar_lea.hbm %s2567_s9, 1024 }
 0x2a0   : > { %p1919_p0 = scmp.ne.s32.totalorder %s2512_s26, %s1918_s24  ;;  %p1923_p11 = scmp.lt.u32.totalorder %s2512_s26, %s2567_s9 }
 0x2a1   : > { %p1924_p13 = scmp.lt.u32.totalorder %s1922_s18, %s1918_s24  ;;  %p1926_p1 = scmp.lt.u32.totalorder %s1918_s24, %s2512_s26 }
 0x2a2   : > { %p1920_p5 = pnand %p1919_p0, %p2182_p6 }
 0x2a3   : > { %p1925_p2 = por %p1924_p13, %p1923_p11 }
 0x2a4   : > { %p1921_p10 = pneg %p1920_p5 }
 0x2a5   : > { %p1927_p4 = por %p1926_p1, %p1925_p2 }
 0x2a7   : > { %p1928_p8 = pnand %p1927_p4, %p1921_p10 }
 0x2a9   : > { %1931 = shalt.err (!%p1928_p8)
}
 0x2aa   : > { %s1990_s1 = smov 128   ;;  %s1991_s14 = smov 8  }
 0x2ab   : > { %1720 = dma.vmem_to_hbm [thread:$0]  (%p2182_p6), %s2514_s15, 256, %s2512_s26, %s1301_s13, %s1990_s1, %s1990_s1, %s1991_s14  }
 0x2ac PF: > { %s2591_s25 = sld [smem:[#allocation15_spill]]  ;;  %p1747_p3 = scmp.ge.s32.totalorder %s1978_s12, 2 }
 0x2ad   : > { %s1329_s28 = sand.u32 1, %s1966_s30  }
 0x2ae   : > { %s1330_s20 = scalar_lea.sflag [#allocation4], %s1329_s28 }
 0x2b2   : > { %p2592_p7 = scmp.ne.s32.totalorder %s2591_s25, 0 }
 0x2b4   : > { %p1737_p9 = pnand %p1747_p3, %p2592_p7 }
 0x2b6   : > { %1961 = dma.done.wait (!%p1737_p9), %s1330_s20, 256  }
 0x2b7   : > { %1963 = vsyncadd (!%p1737_p9), %s1330_s20, 4294967040  ;;  %p24_p12 = scmp.ge.s32.totalorder %s2168_s16, 6   ;;  %s2593_s30 = smov %s1970_s10 }
 0x2b8   : > { %s2594_s10 = smov %s1974_s11  ;;  %s2595_s11 = smov %s2178_s29 }
 0x2b9   : > { %s2596_s12 = smov %s2168_s16  ;;  %26 = sbr.rel (!%p24_p12) target bundleno = 9 (0x9), region = 113 }
 0x2c0   :  { %1335 = vsyncpa [#allocation3], 1 }
 0x2c1   :  { %1337 = vsyncpa [#allocation3 + $0x1], 1 }
 0x2c2   :  { %1338 = vsyncpa [#allocation6], 1 }
 0x2c3   :  { %1339 = vsyncpa [#allocation9], 1 }
 0x2c4   :  { %1340 = vsyncpa [#allocation4], 1 }
 0x2c5   :  { %1342 = vsyncpa [#allocation4 + $0x1], 1 }

</bundles_post_ra>
